<compile_context>
chip_gen: v6e
topology: v6e:2x2x1
jax: 0.10.0
libtpu: 0.0.40
codegen_flags: <defaults>
</compile_context>

<pallas_src>
import functools
import numpy as np
import jax
import jax.numpy as jnp
from jax.experimental import pallas as pl
from jax.experimental.pallas import tpu as pltpu

# ----------------------------- config (synthetic) -----------------------------
B = 2            # batch
T_K = 8          # encoder sequence length
HID = 32         # config.hidden_dim
EMB = 16         # config.emb_dim
VOCAB = 50       # config.vocab_size
EXTRA = 4        # extra OOV slots (extra_zeros width)
VEXT = VOCAB + EXTRA
T_DEC = 4        # fused decode steps (T_DEC=1 reproduces a single Decoder.forward)

VPAD = ((VEXT + 127) // 128) * 128            # lane-dense padded extended vocab
MISC_W = ((4 * HID + 2 * T_K + 1 + 127) // 128) * 128   # packed misc output width


# ----------------------------- the Pallas kernel ------------------------------
def decoder_kernel(
    # scalar prefetch
    y_ids_ref,                                    # SMEM (T_DEC, B) int32
    # data refs (resident, DMA'd once)
    ct1_ref, h0_ref, c0_ref, enc_out_ref, enc_feat_ref, mask_ref, cov0_ref,
    ext_ids_ref,
    # packed parameter refs (resident, DMA'd once)
    emb_ref, wxc_ref, wlstm_ref, wdp_ref, wcovv_ref, wpg_ref, wo1_ref,
    wo2p_ref, bias_ref,
    # outputs (one block per decode step)
    final_ref, misc_ref,
    # VMEM scratch: recurrent state carried across grid iterations
    h_s, c_s, ct_s, cov_s,
):
    f32 = jnp.float32
    bf16 = jnp.bfloat16
    step = pl.program_id(0)

    b_sz, t_k, n2 = enc_out_ref.shape             # n2 == 2*H
    H = n2 // 2
    E = emb_ref.shape[1]
    Vpad = final_ref.shape[-1]

    # ---- initialize recurrent state at step 0 ----
    @pl.when(step == 0)
    def _():
        h_s[...] = h0_ref[...]
        c_s[...] = c0_ref[...]
        ct_s[...] = ct1_ref[...]
        cov_s[...] = cov0_ref[...]

    h_prev = h_s[...]
    c_prev = c_s[...]
    ct_prev = ct_s[...]
    cov = cov_s[...]
    bias = bias_ref[...]                          # (8, 128) packed biases

    # ---- embedding gather: scalar-prefetched ids -> dynamic row slices ----
    rows = [emb_ref[pl.ds(y_ids_ref[step, b], 1), :] for b in range(b_sz)]
    y_emb = jnp.concatenate(rows, axis=0)         # (B, E) f32

    # ---- x = x_context(cat(c_t_1, y_emb)) as split bf16 matmul ----
    wxc = wxc_ref[...]                            # (2H+E, E) bf16
    x = (jnp.dot(ct_prev.astype(bf16), wxc[0:n2, :], preferred_element_type=f32)
         + jnp.dot(y_emb.astype(bf16), wxc[n2:, :], preferred_element_type=f32)
         + bias[0:1, 0:E])                        # (B, E) f32

    # ---- single-step LSTM (PyTorch gate order i, f, g, o) ----
    wl = wlstm_ref[...]                           # (E+H, 4H) bf16
    gates = (jnp.dot(x.astype(bf16), wl[0:E, :], preferred_element_type=f32)
             + jnp.dot(h_prev.astype(bf16), wl[E:, :], preferred_element_type=f32)
             + bias[1:2, :])                      # (B, 4H)
    i_g = jax.nn.sigmoid(gates[:, 0:H])
    f_g = jax.nn.sigmoid(gates[:, H:2 * H])
    g_g = jnp.tanh(gates[:, 2 * H:3 * H])
    o_g = jax.nn.sigmoid(gates[:, 3 * H:4 * H])
    c_new = f_g * c_prev + i_g * g_g              # (B, H)
    h_new = o_g * jnp.tanh(c_new)                 # (B, H) == lstm_out

    # ---- attention (with coverage) ----
    wdp = wdp_ref[...]                            # (2H, 2H) bf16
    dec_fea = (jnp.dot(h_new.astype(bf16), wdp[0:H, :], preferred_element_type=f32)
               + jnp.dot(c_new.astype(bf16), wdp[H:, :], preferred_element_type=f32)
               + bias[2:3, 0:n2])                 # (B, 2H)
    wcovv = wcovv_ref[...]                        # (2, 2H) f32: row0=W_c, row1=v
    wcov = wcovv[0:1, :]
    v_row = wcovv[1:2, :]
    att = enc_feat_ref[...] + dec_fea[:, None, :] + cov[:, :, None] * wcov[None, :, :]
    e = jnp.tanh(att)
    scores = jnp.sum(e * v_row[None, :, :], axis=-1)          # (B, T)

    m = jnp.max(scores, axis=1, keepdims=True)
    ex = jnp.exp(scores - m)
    sm = ex * pl.reciprocal(jnp.sum(ex, axis=1, keepdims=True), approx=True)
    attn_u = sm * mask_ref[...]
    attn = attn_u * pl.reciprocal(jnp.sum(attn_u, axis=1, keepdims=True), approx=True)
    c_t = jnp.sum(attn[:, :, None] * enc_out_ref[...], axis=1)  # (B, 2H)
    cov_next = cov + attn

    # ---- p_gen: single fused lane reduction over [c_t | h | c | x] ----
    pg_in = jnp.concatenate([c_t, h_new, c_new, x], axis=1)   # (B, 4H+E)
    p_lin = jnp.sum(pg_in * wpg_ref[...], axis=1, keepdims=True) + bias[3:4, 0:1]
    p_gen = jax.nn.sigmoid(p_lin)                             # (B, 1)

    # ---- vocab distribution over padded 128-lane vocab (pad logits = -1e30) ----
    wo1 = wo1_ref[...]                            # (3H, H) bf16
    out1 = (jnp.dot(h_new.astype(bf16), wo1[0:H, :], preferred_element_type=f32)
            + jnp.dot(c_t.astype(bf16), wo1[H:, :], preferred_element_type=f32)
            + bias[4:5, 0:H])                     # (B, H)
    logits = (jnp.dot(out1.astype(bf16), wo2p_ref[...], preferred_element_type=f32)
              + bias[5:6, :])                     # (B, Vpad)
    lm = jnp.max(logits, axis=1, keepdims=True)
    le = jnp.exp(logits - lm)
    vocab_dist = le * pl.reciprocal(jnp.sum(le, axis=1, keepdims=True), approx=True)
    # padded lanes (>= V) carry exactly 0 probability.

    # ---- scatter_add of (1-p_gen)*attn into extended vocab (ids < VEXT <= Vpad) ----
    attn_w = (1.0 - p_gen) * attn                             # (B, T)
    ids = ext_ids_ref[...]
    iota_v = jax.lax.broadcasted_iota(jnp.int32, (b_sz, t_k, Vpad), 2)
    hit = iota_v == ids[:, :, None]
    scatter = jnp.sum(jnp.where(hit, attn_w[:, :, None], 0.0), axis=1)  # (B, Vpad)

    # ---- single unmasked lane-dense stores ----
    final_ref[...] = p_gen * vocab_dist + scatter             # (B, Vpad)

    pad_w = misc_ref.shape[-1] - (4 * H + 2 * t_k + 1)
    misc_ref[...] = jnp.concatenate(
        [h_new, c_new, c_t, attn, p_gen, cov_next,
         jnp.zeros((b_sz, pad_w), f32)], axis=1)              # (B, MISC_W)

    # ---- carry recurrent state ----
    h_s[...] = h_new
    c_s[...] = c_new
    ct_s[...] = c_t
    cov_s[...] = cov_next


# --------------------------- host-side param packing ---------------------------
def pack_params(p):
    bf16 = jnp.bfloat16
    wlstm = jnp.concatenate([p["wih"], p["whh"]], axis=0)        # (E+H, 4H)
    wcovv = jnp.concatenate([p["wcov"], p["v"]], axis=0)         # (2, 2H)
    wo2p = jnp.zeros((HID, VPAD), jnp.float32).at[:, :VOCAB].set(p["wo2"])
    bias = jnp.zeros((8, 128), jnp.float32)
    bias = bias.at[0, :EMB].set(p["bxc"][0])
    bias = bias.at[1, :4 * HID].set(p["blstm"][0])
    bias = bias.at[2, :2 * HID].set(p["bdp"][0])
    bias = bias.at[3, 0].set(p["bpg"][0, 0])
    bias = bias.at[4, :HID].set(p["bo1"][0])
    bias = bias.at[5, :].set(-1e30)                              # softmax pad
    bias = bias.at[5, :VOCAB].set(p["bo2"][0])
    return {
        "emb": p["emb"].astype(jnp.float32),
        "wxc": p["wxc"].astype(bf16),
        "wlstm": wlstm.astype(bf16),
        "wdp": p["wdp"].astype(bf16),
        "wcovv": wcovv.astype(jnp.float32),
        "wpg": p["wpg"].astype(jnp.float32),
        "wo1": p["wo1"].astype(bf16),
        "wo2p": wo2p.astype(bf16),
        "bias": bias,
    }


# ------------------------------------ wrapper -----------------------------------
def _resident_spec(shape):
    nd = len(shape)
    return pl.BlockSpec(shape, lambda t, yref, _nd=nd: (0,) * _nd)


@jax.jit
def decoder_decode(packed, y_ids_all, s_t_0, encoder_outputs, encoder_feature,
                   enc_padding_mask, c_t_init, enc_batch_extend_vocab,
                   coverage_init):
    """Runs T_DEC fused decode steps (each grid step == one Decoder.forward,
    training / step>0 path).  T_DEC == 1 reproduces the single-step module."""
    t_dec = y_ids_all.shape[0]
    h0 = s_t_0[0].reshape(B, HID)
    c0 = s_t_0[1].reshape(B, HID)
    enc_feat = encoder_feature.reshape(B, T_K, 2 * HID)
    ext_ids = enc_batch_extend_vocab.astype(jnp.int32)

    data_inputs = (c_t_init, h0, c0, encoder_outputs, enc_feat,
                   enc_padding_mask, coverage_init, ext_ids)
    param_order = ("emb", "wxc", "wlstm", "wdp", "wcovv", "wpg", "wo1",
                   "wo2p", "bias")
    param_inputs = tuple(packed[k] for k in param_order)
    tensor_inputs = data_inputs + param_inputs

    out_shapes = (
        jax.ShapeDtypeStruct((t_dec, B, VPAD), jnp.float32),     # final_dist (padded)
        jax.ShapeDtypeStruct((t_dec, B, MISC_W), jnp.float32),   # packed misc
    )
    out_specs = [
        pl.BlockSpec((None, B, VPAD), lambda t, yref: (t, 0, 0)),
        pl.BlockSpec((None, B, MISC_W), lambda t, yref: (t, 0, 0)),
    ]

    final_pad, misc = pl.pallas_call(
        decoder_kernel,
        out_shape=out_shapes,
        grid_spec=pltpu.PrefetchScalarGridSpec(
            num_scalar_prefetch=1,
            grid=(t_dec,),
            in_specs=[_resident_spec(a.shape) for a in tensor_inputs],
            out_specs=out_specs,
            scratch_shapes=[
                pltpu.VMEM((B, HID), jnp.float32),       # h
                pltpu.VMEM((B, HID), jnp.float32),       # c
                pltpu.VMEM((B, 2 * HID), jnp.float32),   # c_t
                pltpu.VMEM((B, T_K), jnp.float32),       # coverage
            ],
        ),
        # TODO(synk): with a larger batch / beam, add a leading "parallel" grid
        # axis over batch blocks so v7x's second TensorCore is used.
        compiler_params=pltpu.CompilerParams(
            dimension_semantics=("arbitrary",)),
    )(y_ids_all.astype(jnp.int32), *tensor_inputs)

    final_all = final_pad[:, :, :VEXT]
    h_all = misc[:, :, 0:HID]
    c_all = misc[:, :, HID:2 * HID]
    ct_all = misc[:, :, 2 * HID:4 * HID]
    attn_all = misc[:, :, 4 * HID:4 * HID + T_K]
    pgen_all = misc[:, :, 4 * HID + T_K:4 * HID + T_K + 1]
    cov_all = misc[:, :, 4 * HID + T_K + 1:4 * HID + 2 * T_K + 1]
    s_t = (h_all[-1][None], c_all[-1][None])
    return final_all, s_t, ct_all, attn_all, pgen_all, cov_all


# ------------------------------ pure-JAX reference -----------------------------
def reference_decode(params, y_ids_all, s_t_0, encoder_outputs, encoder_feature,
                     enc_padding_mask, c_t_init, enc_batch_extend_vocab,
                     coverage_init):
    h = s_t_0[0].reshape(-1, HID)
    c = s_t_0[1].reshape(-1, HID)
    c_t_1 = c_t_init
    coverage = coverage_init
    enc_feat = encoder_feature.reshape(B, T_K, 2 * HID)
    onehot_ext = jax.nn.one_hot(enc_batch_extend_vocab, VEXT, dtype=jnp.float32)
    finals, cts, attns, pgens, covs = [], [], [], [], []
    for t in range(y_ids_all.shape[0]):
        y_emb = params["emb"][y_ids_all[t]]
        x = jnp.concatenate([c_t_1, y_emb], axis=1) @ params["wxc"] + params["bxc"]
        gates = x @ params["wih"] + h @ params["whh"] + params["blstm"]
        i_g = jax.nn.sigmoid(gates[:, 0:HID])
        f_g = jax.nn.sigmoid(gates[:, HID:2 * HID])
        g_g = jnp.tanh(gates[:, 2 * HID:3 * HID])
        o_g = jax.nn.sigmoid(gates[:, 3 * HID:4 * HID])
        c = f_g * c + i_g * g_g
        h = o_g * jnp.tanh(c)
        s_hat = jnp.concatenate([h, c], axis=1)
        dec_fea = s_hat @ params["wdp"] + params["bdp"]
        att = enc_feat + dec_fea[:, None, :] + coverage[:, :, None] * params["wcov"][None, :, :]
        scores = jnp.sum(jnp.tanh(att) * params["v"][None, :, :], axis=-1)
        sm = jax.nn.softmax(scores, axis=1) * enc_padding_mask
        attn = sm / jnp.sum(sm, axis=1, keepdims=True)
        c_t = jnp.einsum("bt,btn->bn", attn, encoder_outputs)
        coverage = coverage + attn
        pg_in = jnp.concatenate([c_t, s_hat, x], axis=1)
        p_gen = jax.nn.sigmoid(jnp.sum(pg_in * params["wpg"], axis=1, keepdims=True)
                               + params["bpg"])
        out1 = jnp.concatenate([h, c_t], axis=1) @ params["wo1"] + params["bo1"]
        logits = out1 @ params["wo2"] + params["bo2"]
        vocab_dist = jax.nn.softmax(logits, axis=1)
        vocab_dist_ = jnp.concatenate([p_gen * vocab_dist,
                                       jnp.zeros((B, EXTRA), jnp.float32)], axis=1)
        final = vocab_dist_ + jnp.einsum("bt,btv->bv", (1.0 - p_gen) * attn, onehot_ext)
        c_t_1 = c_t
        finals.append(final); cts.append(c_t); attns.append(attn)
        pgens.append(p_gen); covs.append(coverage)
    return (jnp.stack(finals), (h[None], c[None]), jnp.stack(cts),
            jnp.stack(attns), jnp.stack(pgens), jnp.stack(covs))


# ----------------------------------- main ---------------------------------------
if __name__ == "__main__":
    key = jax.random.PRNGKey(0)
    ks = jax.random.split(key, 32)

    def normal(k, shape, scale=0.1):
        return (scale * jax.random.normal(k, shape)).astype(jnp.float32)

    params = {
        "emb":   normal(ks[0], (VOCAB, EMB)),
        "wxc":   normal(ks[1], (2 * HID + EMB, EMB)),
        "bxc":   normal(ks[2], (1, EMB)),
        "wih":   normal(ks[3], (EMB, 4 * HID)),
        "whh":   normal(ks[4], (HID, 4 * HID)),
        "blstm": normal(ks[5], (1, 4 * HID)),
        "wdp":   normal(ks[6], (2 * HID, 2 * HID)),
        "bdp":   normal(ks[7], (1, 2 * HID)),
        "wcov":  normal(ks[8], (1, 2 * HID)),
        "v":     normal(ks[9], (1, 2 * HID)),
        "wpg":   normal(ks[10], (1, 4 * HID + EMB)),
        "bpg":   normal(ks[11], (1, 1)),
        "wo1":   normal(ks[12], (3 * HID, HID)),
        "bo1":   normal(ks[13], (1, HID)),
        "wo2":   normal(ks[14], (HID, VOCAB)),
        "bo2":   normal(ks[15], (1, VOCAB)),
    }

    y_ids_all = jax.random.randint(ks[16], (T_DEC, B), 0, VOCAB, dtype=jnp.int32)
    h0 = normal(ks[17], (1, B, HID), 1.0)
    c0 = normal(ks[18], (1, B, HID), 1.0)
    s_t_0 = (h0, c0)
    encoder_outputs = normal(ks[19], (B, T_K, 2 * HID), 1.0)
    encoder_feature = normal(ks[20], (B * T_K, 2 * HID), 1.0)
    mask_np = np.ones((B, T_K), np.float32)
    mask_np[1, -2:] = 0.0
    enc_padding_mask = jnp.asarray(mask_np)
    c_t_init = normal(ks[21], (B, 2 * HID), 1.0)
    enc_batch_extend_vocab = jax.random.randint(ks[22], (B, T_K), 0, VEXT,
                                                dtype=jnp.int32)
    coverage_init = jnp.zeros((B, T_K), jnp.float32)
    # TODO(synk): the eval-only `step == 0` pre-attention branch is host control
    # flow; only the training / step>0 path is exercised here.

    packed = pack_params(params)
    final_all, s_t, ct_all, attn_all, pgen_all, cov_all = decoder_decode(
        packed, y_ids_all, s_t_0, encoder_outputs, encoder_feature,
        enc_padding_mask, c_t_init, enc_batch_extend_vocab, coverage_init)
    jax.block_until_ready(final_all)

    (ref_final, ref_st, ref_ct, ref_attn, ref_pgen, ref_cov) = reference_decode(
        params, y_ids_all, s_t_0, encoder_outputs, encoder_feature,
        enc_padding_mask, c_t_init, enc_batch_extend_vocab, coverage_init)

    tol = dict(rtol=2e-2, atol=2e-2)
    np.testing.assert_allclose(np.asarray(final_all), np.asarray(ref_final), **tol)
    np.testing.assert_allclose(np.asarray(ct_all), np.asarray(ref_ct), **tol)
    np.testing.assert_allclose(np.asarray(attn_all), np.asarray(ref_attn), **tol)
    np.testing.assert_allclose(np.asarray(pgen_all), np.asarray(ref_pgen), **tol)
    np.testing.assert_allclose(np.asarray(cov_all), np.asarray(ref_cov), **tol)
    np.testing.assert_allclose(np.asarray(s_t[0]), np.asarray(ref_st[0]), **tol)
    np.testing.assert_allclose(np.asarray(s_t[1]), np.asarray(ref_st[1]), **tol)

    print("KERNEL_OK")
</pallas_src>

<mosaic_0001>
module attributes {stable_mosaic.version = 11 : i64} {
  func.func @decoder_kernel(%arg0: i32, %arg1: memref<4x2xi32, #tpu.memory_space<smem>>, %arg2: memref<2x64xf32, #tpu.memory_space<vmem>>, %arg3: memref<2x32xf32, #tpu.memory_space<vmem>>, %arg4: memref<2x32xf32, #tpu.memory_space<vmem>>, %arg5: memref<2x8x64xf32, #tpu.memory_space<vmem>>, %arg6: memref<2x8x64xf32, #tpu.memory_space<vmem>>, %arg7: memref<2x8xf32, #tpu.memory_space<vmem>>, %arg8: memref<2x8xf32, #tpu.memory_space<vmem>>, %arg9: memref<2x8xi32, #tpu.memory_space<vmem>>, %arg10: memref<50x16xf32, #tpu.memory_space<vmem>>, %arg11: memref<80x16xbf16, #tpu.memory_space<vmem>>, %arg12: memref<48x128xbf16, #tpu.memory_space<vmem>>, %arg13: memref<64x64xbf16, #tpu.memory_space<vmem>>, %arg14: memref<2x64xf32, #tpu.memory_space<vmem>>, %arg15: memref<1x144xf32, #tpu.memory_space<vmem>>, %arg16: memref<96x32xbf16, #tpu.memory_space<vmem>>, %arg17: memref<32x128xbf16, #tpu.memory_space<vmem>>, %arg18: memref<8x128xf32, #tpu.memory_space<vmem>>, %arg19: memref<1x2x128xf32, #tpu.memory_space<vmem>>, %arg20: memref<1x2x256xf32, #tpu.memory_space<vmem>>, %arg21: memref<2x32xf32, #tpu.memory_space<vmem>>, %arg22: memref<2x32xf32, #tpu.memory_space<vmem>>, %arg23: memref<2x64xf32, #tpu.memory_space<vmem>>, %arg24: memref<2x8xf32, #tpu.memory_space<vmem>>) attributes {dimension_semantics = [#tpu.dimension_semantics<arbitrary>], iteration_bounds = array<i64: 4>, scalar_prefetch = 1 : i64, scratch_operands = 4 : i64, tpu.core_type = #tpu.core_type<tc>, window_params = [{pipeline_mode = #tpu.pipeline_mode<synchronous>, transform_indices = @transform_0, window_bounds = array<i64: 2, 64>}, {pipeline_mode = #tpu.pipeline_mode<synchronous>, transform_indices = @transform_1, window_bounds = array<i64: 2, 32>}, {pipeline_mode = #tpu.pipeline_mode<synchronous>, transform_indices = @transform_2, window_bounds = array<i64: 2, 32>}, {pipeline_mode = #tpu.pipeline_mode<synchronous>, transform_indices = @transform_3, window_bounds = array<i64: 2, 8, 64>}, {pipeline_mode = #tpu.pipeline_mode<synchronous>, transform_indices = @transform_4, window_bounds = array<i64: 2, 8, 64>}, {pipeline_mode = #tpu.pipeline_mode<synchronous>, transform_indices = @transform_5, window_bounds = array<i64: 2, 8>}, {pipeline_mode = #tpu.pipeline_mode<synchronous>, transform_indices = @transform_6, window_bounds = array<i64: 2, 8>}, {pipeline_mode = #tpu.pipeline_mode<synchronous>, transform_indices = @transform_7, window_bounds = array<i64: 2, 8>}, {pipeline_mode = #tpu.pipeline_mode<synchronous>, transform_indices = @transform_8, window_bounds = array<i64: 50, 16>}, {pipeline_mode = #tpu.pipeline_mode<synchronous>, transform_indices = @transform_9, window_bounds = array<i64: 80, 16>}, {pipeline_mode = #tpu.pipeline_mode<synchronous>, transform_indices = @transform_10, window_bounds = array<i64: 48, 128>}, {pipeline_mode = #tpu.pipeline_mode<synchronous>, transform_indices = @transform_11, window_bounds = array<i64: 64, 64>}, {pipeline_mode = #tpu.pipeline_mode<synchronous>, transform_indices = @transform_12, window_bounds = array<i64: 2, 64>}, {pipeline_mode = #tpu.pipeline_mode<synchronous>, transform_indices = @transform_13, window_bounds = array<i64: 1, 144>}, {pipeline_mode = #tpu.pipeline_mode<synchronous>, transform_indices = @transform_14, window_bounds = array<i64: 96, 32>}, {pipeline_mode = #tpu.pipeline_mode<synchronous>, transform_indices = @transform_15, window_bounds = array<i64: 32, 128>}, {pipeline_mode = #tpu.pipeline_mode<synchronous>, transform_indices = @transform_16, window_bounds = array<i64: 8, 128>}, {transform_indices = @transform_17, window_bounds = array<i64: 1, 2, 128>}, {transform_indices = @transform_18, window_bounds = array<i64: 1, 2, 256>}]} {
    %c0_i32 = arith.constant 0 : i32
    %0 = arith.cmpi eq, %arg0, %c0_i32 : i32
    %1 = arith.extui %0 : i1 to i32
    %c0_i32_0 = arith.constant 0 : i32
    %2 = arith.cmpi ne, %1, %c0_i32_0 : i32
    scf.if %2 {
      %c0_75 = arith.constant 0 : index
      %c0_76 = arith.constant 0 : index
      %187 = vector.load %arg3[%c0_75, %c0_76] : memref<2x32xf32, #tpu.memory_space<vmem>>, vector<2x32xf32>
      %c0_77 = arith.constant 0 : index
      %c0_78 = arith.constant 0 : index
      %188 = vector.load %arg21[%c0_77, %c0_78] : memref<2x32xf32, #tpu.memory_space<vmem>>, vector<2x32xf32>
      tpu.vector_store %arg21[%c0_77, %c0_78], %187 {strides = array<i32>} : memref<2x32xf32, #tpu.memory_space<vmem>>, vector<2x32xf32>,
      %c0_79 = arith.constant 0 : index
      %c0_80 = arith.constant 0 : index
      %189 = vector.load %arg4[%c0_79, %c0_80] : memref<2x32xf32, #tpu.memory_space<vmem>>, vector<2x32xf32>
      %c0_81 = arith.constant 0 : index
      %c0_82 = arith.constant 0 : index
      %190 = vector.load %arg22[%c0_81, %c0_82] : memref<2x32xf32, #tpu.memory_space<vmem>>, vector<2x32xf32>
      tpu.vector_store %arg22[%c0_81, %c0_82], %189 {strides = array<i32>} : memref<2x32xf32, #tpu.memory_space<vmem>>, vector<2x32xf32>,
      %c0_83 = arith.constant 0 : index
      %c0_84 = arith.constant 0 : index
      %191 = vector.load %arg2[%c0_83, %c0_84] : memref<2x64xf32, #tpu.memory_space<vmem>>, vector<2x64xf32>
      %c0_85 = arith.constant 0 : index
      %c0_86 = arith.constant 0 : index
      %192 = vector.load %arg23[%c0_85, %c0_86] : memref<2x64xf32, #tpu.memory_space<vmem>>, vector<2x64xf32>
      tpu.vector_store %arg23[%c0_85, %c0_86], %191 {strides = array<i32>} : memref<2x64xf32, #tpu.memory_space<vmem>>, vector<2x64xf32>,
      %c0_87 = arith.constant 0 : index
      %c0_88 = arith.constant 0 : index
      %193 = vector.load %arg8[%c0_87, %c0_88] : memref<2x8xf32, #tpu.memory_space<vmem>>, vector<2x8xf32>
      %c0_89 = arith.constant 0 : index
      %c0_90 = arith.constant 0 : index
      %194 = vector.load %arg24[%c0_89, %c0_90] : memref<2x8xf32, #tpu.memory_space<vmem>>, vector<2x8xf32>
      tpu.vector_store %arg24[%c0_89, %c0_90], %193 {strides = array<i32>} : memref<2x8xf32, #tpu.memory_space<vmem>>, vector<2x8xf32>,
    } else {
    }
    %c0 = arith.constant 0 : index
    %c0_1 = arith.constant 0 : index
    %3 = vector.load %arg21[%c0, %c0_1] : memref<2x32xf32, #tpu.memory_space<vmem>>, vector<2x32xf32>
    %c0_2 = arith.constant 0 : index
    %c0_3 = arith.constant 0 : index
    %4 = vector.load %arg22[%c0_2, %c0_3] : memref<2x32xf32, #tpu.memory_space<vmem>>, vector<2x32xf32>
    %c0_4 = arith.constant 0 : index
    %c0_5 = arith.constant 0 : index
    %5 = vector.load %arg23[%c0_4, %c0_5] : memref<2x64xf32, #tpu.memory_space<vmem>>, vector<2x64xf32>
    %c0_6 = arith.constant 0 : index
    %c0_7 = arith.constant 0 : index
    %6 = vector.load %arg24[%c0_6, %c0_7] : memref<2x8xf32, #tpu.memory_space<vmem>>, vector<2x8xf32>
    %c0_8 = arith.constant 0 : index
    %c0_9 = arith.constant 0 : index
    %7 = vector.load %arg18[%c0_8, %c0_9] : memref<8x128xf32, #tpu.memory_space<vmem>>, vector<8x128xf32>
    %8 = arith.index_cast %arg0 : i32 to index
    %c0_10 = arith.constant 0 : index
    %9 = memref.load %arg1[%8, %c0_10] : memref<4x2xi32, #tpu.memory_space<smem>>
    %10 = arith.index_cast %9 : i32 to index
    %c0_11 = arith.constant 0 : index
    %11 = vector.load %arg10[%10, %c0_11] : memref<50x16xf32, #tpu.memory_space<vmem>>, vector<1x16xf32>
    %12 = arith.index_cast %arg0 : i32 to index
    %c1 = arith.constant 1 : index
    %13 = memref.load %arg1[%12, %c1] : memref<4x2xi32, #tpu.memory_space<smem>>
    %14 = arith.index_cast %13 : i32 to index
    %c0_12 = arith.constant 0 : index
    %15 = vector.load %arg10[%14, %c0_12] : memref<50x16xf32, #tpu.memory_space<vmem>>, vector<1x16xf32>
    %16 = tpu.concatenate %11, %15 in 0 : vector<1x16xf32>, vector<1x16xf32> -> vector<2x16xf32>
    %c0_13 = arith.constant 0 : index
    %c0_14 = arith.constant 0 : index
    %17 = vector.load %arg11[%c0_13, %c0_14] : memref<80x16xbf16, #tpu.memory_space<vmem>>, vector<80x16xbf16>
    %18 = arith.truncf %5 : vector<2x64xf32> to vector<2x64xbf16>
    %19 = vector.extract_strided_slice %17 {offsets = [0, 0], sizes = [64, 16], strides = [1, 1]} : vector<80x16xbf16> to vector<64x16xbf16>
    %cst = arith.constant dense<0.000000e+00> : vector<2x16xf32>
    %20 = tpu.matmul %18, %19, %cst {dimension_numbers = #tpu.dot_dimension_numbers<[1], [0], [0], [1], [0, 0, 1, 1], [], []>} : vector<2x64xbf16>, vector<64x16xbf16>, vector<2x16xf32> -> vector<2x16xf32>
    %21 = arith.truncf %16 : vector<2x16xf32> to vector<2x16xbf16>
    %22 = vector.extract_strided_slice %17 {offsets = [64, 0], sizes = [16, 16], strides = [1, 1]} : vector<80x16xbf16> to vector<16x16xbf16>
    %cst_15 = arith.constant dense<0.000000e+00> : vector<2x16xf32>
    %23 = tpu.matmul %21, %22, %cst_15 {dimension_numbers = #tpu.dot_dimension_numbers<[1], [0], [0], [1], [0, 0, 1, 1], [], []>} : vector<2x16xbf16>, vector<16x16xbf16>, vector<2x16xf32> -> vector<2x16xf32>
    %24 = arith.addf %20, %23 : vector<2x16xf32>
    %25 = vector.extract_strided_slice %7 {offsets = [0, 0], sizes = [1, 16], strides = [1, 1]} : vector<8x128xf32> to vector<1x16xf32>
    %26 = vector.broadcast %25 : vector<1x16xf32> to vector<2x16xf32>
    %27 = arith.addf %24, %26 : vector<2x16xf32>
    %c0_16 = arith.constant 0 : index
    %c0_17 = arith.constant 0 : index
    %28 = vector.load %arg12[%c0_16, %c0_17] : memref<48x128xbf16, #tpu.memory_space<vmem>>, vector<48x128xbf16>
    %29 = arith.truncf %27 : vector<2x16xf32> to vector<2x16xbf16>
    %30 = vector.extract_strided_slice %28 {offsets = [0, 0], sizes = [16, 128], strides = [1, 1]} : vector<48x128xbf16> to vector<16x128xbf16>
    %cst_18 = arith.constant dense<0.000000e+00> : vector<2x128xf32>
    %31 = tpu.matmul %29, %30, %cst_18 {dimension_numbers = #tpu.dot_dimension_numbers<[1], [0], [0], [1], [0, 0, 1, 1], [], []>} : vector<2x16xbf16>, vector<16x128xbf16>, vector<2x128xf32> -> vector<2x128xf32>
    %32 = arith.truncf %3 : vector<2x32xf32> to vector<2x32xbf16>
    %33 = vector.extract_strided_slice %28 {offsets = [16, 0], sizes = [32, 128], strides = [1, 1]} : vector<48x128xbf16> to vector<32x128xbf16>
    %cst_19 = arith.constant dense<0.000000e+00> : vector<2x128xf32>
    %34 = tpu.matmul %32, %33, %cst_19 {dimension_numbers = #tpu.dot_dimension_numbers<[1], [0], [0], [1], [0, 0, 1, 1], [], []>} : vector<2x32xbf16>, vector<32x128xbf16>, vector<2x128xf32> -> vector<2x128xf32>
    %35 = arith.addf %31, %34 : vector<2x128xf32>
    %36 = vector.extract_strided_slice %7 {offsets = [1, 0], sizes = [1, 128], strides = [1, 1]} : vector<8x128xf32> to vector<1x128xf32>
    %37 = vector.broadcast %36 : vector<1x128xf32> to vector<2x128xf32>
    %38 = arith.addf %35, %37 : vector<2x128xf32>
    %39 = vector.extract_strided_slice %38 {offsets = [0, 0], sizes = [2, 32], strides = [1, 1]} : vector<2x128xf32> to vector<2x32xf32>
    %40 = arith.negf %39 : vector<2x32xf32>
    %41 = math.exp %40 : vector<2x32xf32>
    %cst_20 = arith.constant 1.000000e+00 : f32
    %42 = vector.broadcast %cst_20 : f32 to vector<2x32xf32>
    %43 = arith.addf %42, %41 : vector<2x32xf32>
    %44 = arith.divf %42, %43 : vector<2x32xf32>
    %45 = vector.extract_strided_slice %38 {offsets = [0, 32], sizes = [2, 32], strides = [1, 1]} : vector<2x128xf32> to vector<2x32xf32>
    %46 = arith.negf %45 : vector<2x32xf32>
    %47 = math.exp %46 : vector<2x32xf32>
    %cst_21 = arith.constant 1.000000e+00 : f32
    %48 = vector.broadcast %cst_21 : f32 to vector<2x32xf32>
    %49 = arith.addf %48, %47 : vector<2x32xf32>
    %50 = arith.divf %48, %49 : vector<2x32xf32>
    %51 = vector.extract_strided_slice %38 {offsets = [0, 64], sizes = [2, 32], strides = [1, 1]} : vector<2x128xf32> to vector<2x32xf32>
    %52 = math.tanh %51 : vector<2x32xf32>
    %53 = vector.extract_strided_slice %38 {offsets = [0, 96], sizes = [2, 32], strides = [1, 1]} : vector<2x128xf32> to vector<2x32xf32>
    %54 = arith.negf %53 : vector<2x32xf32>
    %55 = math.exp %54 : vector<2x32xf32>
    %cst_22 = arith.constant 1.000000e+00 : f32
    %56 = vector.broadcast %cst_22 : f32 to vector<2x32xf32>
    %57 = arith.addf %56, %55 : vector<2x32xf32>
    %58 = arith.divf %56, %57 : vector<2x32xf32>
    %59 = arith.mulf %50, %4 : vector<2x32xf32>
    %60 = arith.mulf %44, %52 : vector<2x32xf32>
    %61 = arith.addf %59, %60 : vector<2x32xf32>
    %62 = math.tanh %61 : vector<2x32xf32>
    %63 = arith.mulf %58, %62 : vector<2x32xf32>
    %c0_23 = arith.constant 0 : index
    %c0_24 = arith.constant 0 : index
    %64 = vector.load %arg13[%c0_23, %c0_24] : memref<64x64xbf16, #tpu.memory_space<vmem>>, vector<64x64xbf16>
    %65 = arith.truncf %63 : vector<2x32xf32> to vector<2x32xbf16>
    %66 = vector.extract_strided_slice %64 {offsets = [0, 0], sizes = [32, 64], strides = [1, 1]} : vector<64x64xbf16> to vector<32x64xbf16>
    %cst_25 = arith.constant dense<0.000000e+00> : vector<2x64xf32>
    %67 = tpu.matmul %65, %66, %cst_25 {dimension_numbers = #tpu.dot_dimension_numbers<[1], [0], [0], [1], [0, 0, 1, 1], [], []>} : vector<2x32xbf16>, vector<32x64xbf16>, vector<2x64xf32> -> vector<2x64xf32>
    %68 = arith.truncf %61 : vector<2x32xf32> to vector<2x32xbf16>
    %69 = vector.extract_strided_slice %64 {offsets = [32, 0], sizes = [32, 64], strides = [1, 1]} : vector<64x64xbf16> to vector<32x64xbf16>
    %cst_26 = arith.constant dense<0.000000e+00> : vector<2x64xf32>
    %70 = tpu.matmul %68, %69, %cst_26 {dimension_numbers = #tpu.dot_dimension_numbers<[1], [0], [0], [1], [0, 0, 1, 1], [], []>} : vector<2x32xbf16>, vector<32x64xbf16>, vector<2x64xf32> -> vector<2x64xf32>
    %71 = arith.addf %67, %70 : vector<2x64xf32>
    %72 = vector.extract_strided_slice %7 {offsets = [2, 0], sizes = [1, 64], strides = [1, 1]} : vector<8x128xf32> to vector<1x64xf32>
    %73 = vector.broadcast %72 : vector<1x64xf32> to vector<2x64xf32>
    %74 = arith.addf %71, %73 : vector<2x64xf32>
    %c0_27 = arith.constant 0 : index
    %c0_28 = arith.constant 0 : index
    %75 = vector.load %arg14[%c0_27, %c0_28] : memref<2x64xf32, #tpu.memory_space<vmem>>, vector<2x64xf32>
    %76 = vector.extract_strided_slice %75 {offsets = [0, 0], sizes = [1, 64], strides = [1, 1]} : vector<2x64xf32> to vector<1x64xf32>
    %77 = vector.extract_strided_slice %75 {offsets = [1, 0], sizes = [1, 64], strides = [1, 1]} : vector<2x64xf32> to vector<1x64xf32>
    %c0_29 = arith.constant 0 : index
    %c0_30 = arith.constant 0 : index
    %c0_31 = arith.constant 0 : index
    %78 = vector.load %arg6[%c0_29, %c0_30, %c0_31] : memref<2x8x64xf32, #tpu.memory_space<vmem>>, vector<2x8x64xf32>
    %79 = vector.shape_cast %74 : vector<2x64xf32> to vector<2x1x64xf32>
    %80 = vector.broadcast %79 : vector<2x1x64xf32> to vector<2x8x64xf32>
    %81 = arith.addf %78, %80 : vector<2x8x64xf32>
    %82 = vector.shape_cast %6 : vector<2x8xf32> to vector<2x8x1xf32>
    %83 = vector.shape_cast %76 : vector<1x64xf32> to vector<1x1x64xf32>
    %84 = vector.broadcast %82 : vector<2x8x1xf32> to vector<2x8x64xf32>
    %85 = vector.broadcast %83 : vector<1x1x64xf32> to vector<2x8x64xf32>
    %86 = arith.mulf %84, %85 : vector<2x8x64xf32>
    %87 = arith.addf %81, %86 : vector<2x8x64xf32>
    %88 = math.tanh %87 : vector<2x8x64xf32>
    %89 = vector.shape_cast %77 : vector<1x64xf32> to vector<1x1x64xf32>
    %90 = vector.broadcast %89 : vector<1x1x64xf32> to vector<2x8x64xf32>
    %91 = arith.mulf %88, %90 : vector<2x8x64xf32>
    %cst_32 = arith.constant dense<0.000000e+00> : vector<2x8xf32>
    %92 = vector.multi_reduction <add>, %91, %cst_32 [2] : vector<2x8x64xf32> to vector<2x8xf32>
    %cst_33 = arith.constant dense<0xFF800000> : vector<2xf32>
    %93 = vector.multi_reduction <maximumf>, %92, %cst_33 [1] : vector<2x8xf32> to vector<2xf32>
    %94 = vector.shape_cast %93 : vector<2xf32> to vector<2x1xf32>
    %95 = vector.broadcast %94 : vector<2x1xf32> to vector<2x8xf32>
    %96 = arith.subf %92, %95 : vector<2x8xf32>
    %97 = math.exp %96 : vector<2x8xf32>
    %cst_34 = arith.constant dense<0.000000e+00> : vector<2xf32>
    %98 = vector.multi_reduction <add>, %97, %cst_34 [1] : vector<2x8xf32> to vector<2xf32>
    %99 = vector.shape_cast %98 : vector<2xf32> to vector<2x1xf32>
    %100 = tpu.reciprocal %99 {approx = true} : vector<2x1xf32> -> vector<2x1xf32>
    %101 = vector.broadcast %100 : vector<2x1xf32> to vector<2x8xf32>
    %102 = arith.mulf %97, %101 : vector<2x8xf32>
    %c0_35 = arith.constant 0 : index
    %c0_36 = arith.constant 0 : index
    %103 = vector.load %arg7[%c0_35, %c0_36] : memref<2x8xf32, #tpu.memory_space<vmem>>, vector<2x8xf32>
    %104 = arith.mulf %102, %103 : vector<2x8xf32>
    %cst_37 = arith.constant dense<0.000000e+00> : vector<2xf32>
    %105 = vector.multi_reduction <add>, %104, %cst_37 [1] : vector<2x8xf32> to vector<2xf32>
    %106 = vector.shape_cast %105 : vector<2xf32> to vector<2x1xf32>
    %107 = tpu.reciprocal %106 {approx = true} : vector<2x1xf32> -> vector<2x1xf32>
    %108 = vector.broadcast %107 : vector<2x1xf32> to vector<2x8xf32>
    %109 = arith.mulf %104, %108 : vector<2x8xf32>
    %110 = vector.shape_cast %109 : vector<2x8xf32> to vector<2x8x1xf32>
    %c0_38 = arith.constant 0 : index
    %c0_39 = arith.constant 0 : index
    %c0_40 = arith.constant 0 : index
    %111 = vector.load %arg5[%c0_38, %c0_39, %c0_40] : memref<2x8x64xf32, #tpu.memory_space<vmem>>, vector<2x8x64xf32>
    %112 = vector.broadcast %110 : vector<2x8x1xf32> to vector<2x8x64xf32>
    %113 = arith.mulf %112, %111 : vector<2x8x64xf32>
    %cst_41 = arith.constant dense<0.000000e+00> : vector<2x64xf32>
    %114 = vector.multi_reduction <add>, %113, %cst_41 [1] : vector<2x8x64xf32> to vector<2x64xf32>
    %115 = arith.addf %6, %109 : vector<2x8xf32>
    %116 = tpu.concatenate %114, %63, %61, %27 in 1 : vector<2x64xf32>, vector<2x32xf32>, vector<2x32xf32>, vector<2x16xf32> -> vector<2x144xf32>
    %c0_42 = arith.constant 0 : index
    %c0_43 = arith.constant 0 : index
    %117 = vector.load %arg15[%c0_42, %c0_43] : memref<1x144xf32, #tpu.memory_space<vmem>>, vector<1x144xf32>
    %118 = vector.broadcast %117 : vector<1x144xf32> to vector<2x144xf32>
    %119 = arith.mulf %116, %118 : vector<2x144xf32>
    %cst_44 = arith.constant dense<0.000000e+00> : vector<2xf32>
    %120 = vector.multi_reduction <add>, %119, %cst_44 [1] : vector<2x144xf32> to vector<2xf32>
    %121 = vector.shape_cast %120 : vector<2xf32> to vector<2x1xf32>
    %122 = vector.extract_strided_slice %7 {offsets = [3, 0], sizes = [1, 1], strides = [1, 1]} : vector<8x128xf32> to vector<1x1xf32>
    %123 = vector.broadcast %122 : vector<1x1xf32> to vector<2x1xf32>
    %124 = arith.addf %121, %123 : vector<2x1xf32>
    %125 = arith.negf %124 : vector<2x1xf32>
    %126 = math.exp %125 : vector<2x1xf32>
    %cst_45 = arith.constant 1.000000e+00 : f32
    %127 = vector.broadcast %cst_45 : f32 to vector<2x1xf32>
    %128 = arith.addf %127, %126 : vector<2x1xf32>
    %129 = arith.divf %127, %128 : vector<2x1xf32>
    %c0_46 = arith.constant 0 : index
    %c0_47 = arith.constant 0 : index
    %130 = vector.load %arg16[%c0_46, %c0_47] : memref<96x32xbf16, #tpu.memory_space<vmem>>, vector<96x32xbf16>
    %131 = arith.truncf %63 : vector<2x32xf32> to vector<2x32xbf16>
    %132 = vector.extract_strided_slice %130 {offsets = [0, 0], sizes = [32, 32], strides = [1, 1]} : vector<96x32xbf16> to vector<32x32xbf16>
    %cst_48 = arith.constant dense<0.000000e+00> : vector<2x32xf32>
    %133 = tpu.matmul %131, %132, %cst_48 {dimension_numbers = #tpu.dot_dimension_numbers<[1], [0], [0], [1], [0, 0, 1, 1], [], []>} : vector<2x32xbf16>, vector<32x32xbf16>, vector<2x32xf32> -> vector<2x32xf32>
    %134 = arith.truncf %114 : vector<2x64xf32> to vector<2x64xbf16>
    %135 = vector.extract_strided_slice %130 {offsets = [32, 0], sizes = [64, 32], strides = [1, 1]} : vector<96x32xbf16> to vector<64x32xbf16>
    %cst_49 = arith.constant dense<0.000000e+00> : vector<2x32xf32>
    %136 = tpu.matmul %134, %135, %cst_49 {dimension_numbers = #tpu.dot_dimension_numbers<[1], [0], [0], [1], [0, 0, 1, 1], [], []>} : vector<2x64xbf16>, vector<64x32xbf16>, vector<2x32xf32> -> vector<2x32xf32>
    %137 = arith.addf %133, %136 : vector<2x32xf32>
    %138 = vector.extract_strided_slice %7 {offsets = [4, 0], sizes = [1, 32], strides = [1, 1]} : vector<8x128xf32> to vector<1x32xf32>
    %139 = vector.broadcast %138 : vector<1x32xf32> to vector<2x32xf32>
    %140 = arith.addf %137, %139 : vector<2x32xf32>
    %141 = arith.truncf %140 : vector<2x32xf32> to vector<2x32xbf16>
    %c0_50 = arith.constant 0 : index
    %c0_51 = arith.constant 0 : index
    %142 = vector.load %arg17[%c0_50, %c0_51] : memref<32x128xbf16, #tpu.memory_space<vmem>>, vector<32x128xbf16>
    %cst_52 = arith.constant dense<0.000000e+00> : vector<2x128xf32>
    %143 = tpu.matmul %141, %142, %cst_52 {dimension_numbers = #tpu.dot_dimension_numbers<[1], [0], [0], [1], [0, 0, 1, 1], [], []>} : vector<2x32xbf16>, vector<32x128xbf16>, vector<2x128xf32> -> vector<2x128xf32>
    %144 = vector.extract_strided_slice %7 {offsets = [5, 0], sizes = [1, 128], strides = [1, 1]} : vector<8x128xf32> to vector<1x128xf32>
    %145 = vector.broadcast %144 : vector<1x128xf32> to vector<2x128xf32>
    %146 = arith.addf %143, %145 : vector<2x128xf32>
    %cst_53 = arith.constant dense<0xFF800000> : vector<2xf32>
    %147 = vector.multi_reduction <maximumf>, %146, %cst_53 [1] : vector<2x128xf32> to vector<2xf32>
    %148 = vector.shape_cast %147 : vector<2xf32> to vector<2x1xf32>
    %149 = vector.broadcast %148 : vector<2x1xf32> to vector<2x128xf32>
    %150 = arith.subf %146, %149 : vector<2x128xf32>
    %151 = math.exp %150 : vector<2x128xf32>
    %cst_54 = arith.constant dense<0.000000e+00> : vector<2xf32>
    %152 = vector.multi_reduction <add>, %151, %cst_54 [1] : vector<2x128xf32> to vector<2xf32>
    %153 = vector.shape_cast %152 : vector<2xf32> to vector<2x1xf32>
    %154 = tpu.reciprocal %153 {approx = true} : vector<2x1xf32> -> vector<2x1xf32>
    %155 = vector.broadcast %154 : vector<2x1xf32> to vector<2x128xf32>
    %156 = arith.mulf %151, %155 : vector<2x128xf32>
    %cst_55 = arith.constant 1.000000e+00 : f32
    %157 = vector.broadcast %cst_55 : f32 to vector<2x1xf32>
    %158 = arith.subf %157, %129 : vector<2x1xf32>
    %159 = vector.broadcast %158 : vector<2x1xf32> to vector<2x8xf32>
    %160 = arith.mulf %159, %109 : vector<2x8xf32>
    %c0_56 = arith.constant 0 : index
    %c0_57 = arith.constant 0 : index
    %161 = vector.load %arg9[%c0_56, %c0_57] : memref<2x8xi32, #tpu.memory_space<vmem>>, vector<2x8xi32>
    %162 = tpu.iota {dimensions = array<i32: 2>} : vector<2x8x128xi32>
    %163 = vector.shape_cast %161 : vector<2x8xi32> to vector<2x8x1xi32>
    %164 = vector.broadcast %163 : vector<2x8x1xi32> to vector<2x8x128xi32>
    %165 = arith.cmpi eq, %162, %164 : vector<2x8x128xi32>
    %166 = vector.shape_cast %160 : vector<2x8xf32> to vector<2x8x1xf32>
    %cst_58 = arith.constant 0.000000e+00 : f32
    %167 = vector.shape_cast %166 : vector<2x8x1xf32> to vector<2x8x1xf32>
    %168 = vector.broadcast %167 : vector<2x8x1xf32> to vector<2x8x128xf32>
    %169 = vector.broadcast %cst_58 : f32 to vector<2x8x128xf32>
    %170 = arith.select %165, %168, %169 : vector<2x8x128xi1>, vector<2x8x128xf32>
    %cst_59 = arith.constant dense<0.000000e+00> : vector<2x128xf32>
    %171 = vector.multi_reduction <add>, %170, %cst_59 [1] : vector<2x8x128xf32> to vector<2x128xf32>
    %172 = vector.broadcast %129 : vector<2x1xf32> to vector<2x128xf32>
    %173 = arith.mulf %172, %156 : vector<2x128xf32>
    %174 = arith.addf %173, %171 : vector<2x128xf32>
    %c0_60 = arith.constant 0 : index
    %c0_61 = arith.constant 0 : index
    %c0_62 = arith.constant 0 : index
    %175 = vector.load %arg19[%c0_60, %c0_61, %c0_62] : memref<1x2x128xf32, #tpu.memory_space<vmem>>, vector<1x2x128xf32>
    %176 = vector.shape_cast %175 : vector<1x2x128xf32> to vector<2x128xf32>
    %177 = vector.shape_cast %174 : vector<2x128xf32> to vector<1x2x128xf32>
    tpu.vector_store %arg19[%c0_60, %c0_61, %c0_62], %177 {strides = array<i32>} : memref<1x2x128xf32, #tpu.memory_space<vmem>>, vector<1x2x128xf32>,
    %cst_63 = arith.constant 0.000000e+00 : f32
    %178 = vector.broadcast %cst_63 : f32 to vector<2x111xf32>
    %179 = tpu.concatenate %63, %61, %114, %109, %129, %115, %178 in 1 : vector<2x32xf32>, vector<2x32xf32>, vector<2x64xf32>, vector<2x8xf32>, vector<2x1xf32>, vector<2x8xf32>, vector<2x111xf32> -> vector<2x256xf32>
    %c0_64 = arith.constant 0 : index
    %c0_65 = arith.constant 0 : index
    %c0_66 = arith.constant 0 : index
    %180 = vector.load %arg20[%c0_64, %c0_65, %c0_66] : memref<1x2x256xf32, #tpu.memory_space<vmem>>, vector<1x2x256xf32>
    %181 = vector.shape_cast %180 : vector<1x2x256xf32> to vector<2x256xf32>
    %182 = vector.shape_cast %179 : vector<2x256xf32> to vector<1x2x256xf32>
    tpu.vector_store %arg20[%c0_64, %c0_65, %c0_66], %182 {strides = array<i32>} : memref<1x2x256xf32, #tpu.memory_space<vmem>>, vector<1x2x256xf32>,
    %c0_67 = arith.constant 0 : index
    %c0_68 = arith.constant 0 : index
    %183 = vector.load %arg21[%c0_67, %c0_68] : memref<2x32xf32, #tpu.memory_space<vmem>>, vector<2x32xf32>
    tpu.vector_store %arg21[%c0_67, %c0_68], %63 {strides = array<i32>} : memref<2x32xf32, #tpu.memory_space<vmem>>, vector<2x32xf32>,
    %c0_69 = arith.constant 0 : index
    %c0_70 = arith.constant 0 : index
    %184 = vector.load %arg22[%c0_69, %c0_70] : memref<2x32xf32, #tpu.memory_space<vmem>>, vector<2x32xf32>
    tpu.vector_store %arg22[%c0_69, %c0_70], %61 {strides = array<i32>} : memref<2x32xf32, #tpu.memory_space<vmem>>, vector<2x32xf32>,
    %c0_71 = arith.constant 0 : index
    %c0_72 = arith.constant 0 : index
    %185 = vector.load %arg23[%c0_71, %c0_72] : memref<2x64xf32, #tpu.memory_space<vmem>>, vector<2x64xf32>
    tpu.vector_store %arg23[%c0_71, %c0_72], %114 {strides = array<i32>} : memref<2x64xf32, #tpu.memory_space<vmem>>, vector<2x64xf32>,
    %c0_73 = arith.constant 0 : index
    %c0_74 = arith.constant 0 : index
    %186 = vector.load %arg24[%c0_73, %c0_74] : memref<2x8xf32, #tpu.memory_space<vmem>>, vector<2x8xf32>
    tpu.vector_store %arg24[%c0_73, %c0_74], %115 {strides = array<i32>} : memref<2x8xf32, #tpu.memory_space<vmem>>, vector<2x8xf32>,
    return
  }
  func.func @transform_0(%arg0: i32, %arg1: memref<4x2xi32, #tpu.memory_space<smem>>) -> (i32, i32) {
    %c0_i32 = arith.constant 0 : i32
    %c0_i32_0 = arith.constant 0 : i32
    %c0_i32_1 = arith.constant 0 : i32
    return %c0_i32, %c0_i32_0 : i32, i32
  }
  func.func @transform_1(%arg0: i32, %arg1: memref<4x2xi32, #tpu.memory_space<smem>>) -> (i32, i32) {
    %c0_i32 = arith.constant 0 : i32
    %c0_i32_0 = arith.constant 0 : i32
    %c0_i32_1 = arith.constant 0 : i32
    return %c0_i32, %c0_i32_0 : i32, i32
  }
  func.func @transform_2(%arg0: i32, %arg1: memref<4x2xi32, #tpu.memory_space<smem>>) -> (i32, i32) {
    %c0_i32 = arith.constant 0 : i32
    %c0_i32_0 = arith.constant 0 : i32
    %c0_i32_1 = arith.constant 0 : i32
    return %c0_i32, %c0_i32_0 : i32, i32
  }
  func.func @transform_3(%arg0: i32, %arg1: memref<4x2xi32, #tpu.memory_space<smem>>) -> (i32, i32, i32) {
    %c0_i32 = arith.constant 0 : i32
    %c0_i32_0 = arith.constant 0 : i32
    %c0_i32_1 = arith.constant 0 : i32
    %c0_i32_2 = arith.constant 0 : i32
    return %c0_i32, %c0_i32_0, %c0_i32_1 : i32, i32, i32
  }
  func.func @transform_4(%arg0: i32, %arg1: memref<4x2xi32, #tpu.memory_space<smem>>) -> (i32, i32, i32) {
    %c0_i32 = arith.constant 0 : i32
    %c0_i32_0 = arith.constant 0 : i32
    %c0_i32_1 = arith.constant 0 : i32
    %c0_i32_2 = arith.constant 0 : i32
    return %c0_i32, %c0_i32_0, %c0_i32_1 : i32, i32, i32
  }
  func.func @transform_5(%arg0: i32, %arg1: memref<4x2xi32, #tpu.memory_space<smem>>) -> (i32, i32) {
    %c0_i32 = arith.constant 0 : i32
    %c0_i32_0 = arith.constant 0 : i32
    %c0_i32_1 = arith.constant 0 : i32
    return %c0_i32, %c0_i32_0 : i32, i32
  }
  func.func @transform_6(%arg0: i32, %arg1: memref<4x2xi32, #tpu.memory_space<smem>>) -> (i32, i32) {
    %c0_i32 = arith.constant 0 : i32
    %c0_i32_0 = arith.constant 0 : i32
    %c0_i32_1 = arith.constant 0 : i32
    return %c0_i32, %c0_i32_0 : i32, i32
  }
  func.func @transform_7(%arg0: i32, %arg1: memref<4x2xi32, #tpu.memory_space<smem>>) -> (i32, i32) {
    %c0_i32 = arith.constant 0 : i32
    %c0_i32_0 = arith.constant 0 : i32
    %c0_i32_1 = arith.constant 0 : i32
    return %c0_i32, %c0_i32_0 : i32, i32
  }
  func.func @transform_8(%arg0: i32, %arg1: memref<4x2xi32, #tpu.memory_space<smem>>) -> (i32, i32) {
    %c0_i32 = arith.constant 0 : i32
    %c0_i32_0 = arith.constant 0 : i32
    %c0_i32_1 = arith.constant 0 : i32
    return %c0_i32, %c0_i32_0 : i32, i32
  }
  func.func @transform_9(%arg0: i32, %arg1: memref<4x2xi32, #tpu.memory_space<smem>>) -> (i32, i32) {
    %c0_i32 = arith.constant 0 : i32
    %c0_i32_0 = arith.constant 0 : i32
    %c0_i32_1 = arith.constant 0 : i32
    return %c0_i32, %c0_i32_0 : i32, i32
  }
  func.func @transform_10(%arg0: i32, %arg1: memref<4x2xi32, #tpu.memory_space<smem>>) -> (i32, i32) {
    %c0_i32 = arith.constant 0 : i32
    %c0_i32_0 = arith.constant 0 : i32
    %c0_i32_1 = arith.constant 0 : i32
    return %c0_i32, %c0_i32_0 : i32, i32
  }
  func.func @transform_11(%arg0: i32, %arg1: memref<4x2xi32, #tpu.memory_space<smem>>) -> (i32, i32) {
    %c0_i32 = arith.constant 0 : i32
    %c0_i32_0 = arith.constant 0 : i32
    %c0_i32_1 = arith.constant 0 : i32
    return %c0_i32, %c0_i32_0 : i32, i32
  }
  func.func @transform_12(%arg0: i32, %arg1: memref<4x2xi32, #tpu.memory_space<smem>>) -> (i32, i32) {
    %c0_i32 = arith.constant 0 : i32
    %c0_i32_0 = arith.constant 0 : i32
    %c0_i32_1 = arith.constant 0 : i32
    return %c0_i32, %c0_i32_0 : i32, i32
  }
  func.func @transform_13(%arg0: i32, %arg1: memref<4x2xi32, #tpu.memory_space<smem>>) -> (i32, i32) {
    %c0_i32 = arith.constant 0 : i32
    %c0_i32_0 = arith.constant 0 : i32
    %c0_i32_1 = arith.constant 0 : i32
    return %c0_i32, %c0_i32_0 : i32, i32
  }
  func.func @transform_14(%arg0: i32, %arg1: memref<4x2xi32, #tpu.memory_space<smem>>) -> (i32, i32) {
    %c0_i32 = arith.constant 0 : i32
    %c0_i32_0 = arith.constant 0 : i32
    %c0_i32_1 = arith.constant 0 : i32
    return %c0_i32, %c0_i32_0 : i32, i32
  }
  func.func @transform_15(%arg0: i32, %arg1: memref<4x2xi32, #tpu.memory_space<smem>>) -> (i32, i32) {
    %c0_i32 = arith.constant 0 : i32
    %c0_i32_0 = arith.constant 0 : i32
    %c0_i32_1 = arith.constant 0 : i32
    return %c0_i32, %c0_i32_0 : i32, i32
  }
  func.func @transform_16(%arg0: i32, %arg1: memref<4x2xi32, #tpu.memory_space<smem>>) -> (i32, i32) {
    %c0_i32 = arith.constant 0 : i32
    %c0_i32_0 = arith.constant 0 : i32
    %c0_i32_1 = arith.constant 0 : i32
    return %c0_i32, %c0_i32_0 : i32, i32
  }
  func.func @transform_17(%arg0: i32, %arg1: memref<4x2xi32, #tpu.memory_space<smem>>) -> (i32, i32, i32) {
    %c0_i32 = arith.constant 0 : i32
    %c0_i32_0 = arith.constant 0 : i32
    %c0_i32_1 = arith.constant 0 : i32
    return %arg0, %c0_i32, %c0_i32_0 : i32, i32, i32
  }
  func.func @transform_18(%arg0: i32, %arg1: memref<4x2xi32, #tpu.memory_space<smem>>) -> (i32, i32, i32) {
    %c0_i32 = arith.constant 0 : i32
    %c0_i32_0 = arith.constant 0 : i32
    %c0_i32_1 = arith.constant 0 : i32
    return %arg0, %c0_i32, %c0_i32_0 : i32, i32, i32
  }
}

</mosaic_0001>

<bundles_post_ra>
// kernel: decoder_decode.1
= control target key start
LH: loop header
LB: loop body
LE: loop exit
PB: predicated region body
PF: predicated region fallthrough
CT: control target
= control target key end

     0   :  { %s2557_s0 = inlined_call_operand.vmem [shape: s32[4,2], index: 0, kind: input, shape index: {}]   ;;  %s2558_s1 = inlined_call_operand.vmem [shape: f32[2,64], index: 1, kind: input, shape index: {}]   ;;  %s2559_s2 = inlined_call_operand.vmem [shape: f32[2,32], index: 2, kind: input, shape index: {}]   ;;  %s2560_s3 = inlined_call_operand.vmem [shape: f32[2,32], index: 3, kind: input, shape index: {}]   ;;  %s2561_s4 = inlined_call_operand.vmem [shape: f32[2,8,64], index: 4, kind: input, shape index: {}]   ;;  %s2562_s5 = inlined_call_operand.vmem [shape: f32[2,8,64], index: 5, kind: input, shape index: {}]   ;;  %s2563_s6 = inlined_call_operand.vmem [shape: f32[2,8], index: 6, kind: input, shape index: {}]   ;;  %s2564_s7 = inlined_call_operand.vmem [shape: f32[2,8], index: 7, kind: input, shape index: {}]   ;;  %s2565_s8 = inlined_call_operand.vmem [shape: s32[2,8], index: 8, kind: input, shape index: {}]   ;;  %s2566_s9 = inlined_call_operand.vmem [shape: f32[50,16], index: 9, kind: input, shape index: {}]   ;;  %s2567_s10 = inlined_call_operand.vmem [shape: bf16[80,16], index: 10, kind: input, shape index: {}]   ;;  %s2568_s11 = inlined_call_operand.vmem [shape: bf16[48,128], index: 11, kind: input, shape index: {}]   ;;  %s2569_s12 = inlined_call_operand.vmem [shape: bf16[64,64], index: 12, kind: input, shape index: {}]   ;;  %s2570_s13 = inlined_call_operand.vmem [shape: f32[2,64], index: 13, kind: input, shape index: {}]   ;;  %s2571_s14 = inlined_call_operand.vmem [shape: f32[1,144], index: 14, kind: input, shape index: {}]   ;;  %s2572_s15 = inlined_call_operand.vmem [shape: bf16[96,32], index: 15, kind: input, shape index: {}]   ;;  %s2573_s16 = inlined_call_operand.vmem [shape: bf16[32,128], index: 16, kind: input, shape index: {}]   ;;  %s2574_s17 = inlined_call_operand.vmem [shape: f32[8,128], index: 17, kind: input, shape index: {}]   ;;  %s2575_s18 = inlined_call_operand.hbm [shape: f32[4,2,128], index: 18, kind: output, shape index: {0}]   ;;  %s2576_s19 = inlined_call_operand.vmem [shape: f32[4,2,256], index: 19, kind: output, shape index: {1}]  }
   0x1   :  { %2584 = sst [smem:[#allocation18_spill]] %s2557_s0 }
   0x2   :  { %2585 = sst [smem:[#allocation19_spill]] %s2558_s1 }
   0x3   :  { %2586 = sst [smem:[#allocation20_spill]] %s2559_s2 }
   0x4   :  { %2587 = sst [smem:[#allocation21_spill]] %s2560_s3 }
   0x5   :  { %2588 = sst [smem:[#allocation22_spill]] %s2565_s8 }
   0x6   :  { %s2589_s20 = sld [smem:[#allocation18_spill]] }
   0xc   :  { %s25_s8 = sshll.u32 %s2589_s20, 4  ;;  %s26_s8 = int_to_ptr.vmem [resolvable:$true] %s25_s8 }
   0xd   :  { %s1976_s21 = scalar_lea.vmem %s26_s8, 64  ;;  %p1981_p1 = scmp.lt.s32.totalorder %s26_s8, %s26_s8 }
   0xe   :  { %p1977_p0 = scmp.ne.s32.totalorder %s26_s8, %s1976_s21  ;;  %p1982_p2 = scmp.lt.s32.totalorder %s1976_s21, %s1976_s21 }
  0x10   :  { %p1983_p3 = por %p1982_p2, %p1981_p1 }
  0x12   :  { %p1984_p4 = pnand %p1983_p3, %p1977_p0 }
  0x14   :  { %1987 = shalt.err (!%p1984_p4)  }
  0x15   :  { %s2052_s1 = smov [#allocation7]  }
  0x16   :  { %28 = dma.vmem_to_smem %s26_s8, 64, %s2052_s1, [#allocation6] }
  0x17   :  { %2030 = dma.done.wait [#allocation6], 64 }
  0x18   :  { %2031 = vsyncadd [#allocation6], 4294967232 }
  0x19   :  { %30 = sfence }
  0x1a   :  { %31 = vsyncpa [#allocation9], 0 }
  0x1b   :  { %33 = vsyncpa [#allocation9 + $0x1], 0  ;;  %s2166_s22 = smov 0   ;;  %s2168_s2 = smov 0  }
  0x1c   :  { %s2170_s23 = smov 0   ;;  %s2172_s24 = smov 0  }
  0x1d LB: > { %2590 = sst [smem:[#allocation12_spill]] %s2038_s22  ;;  %s2187_s8 = sadd.s32 4294967295, %s2050_s24   ;;  %s2050_s24 = sphi %s2172_s24, %s2608_s24   ;;  %s2046_s23 = sphi %s2170_s23, %s2610_s23   ;;  %s2042_s2 = sphi %s2168_s2, %s2612_s2   ;;  %s2038_s22 = sphi %s2166_s22, %s2611_s22  }
  0x1e   : > { %2591 = sst [smem:[#allocation13_spill]] %s2046_s23  ;;  %s1727_s25 = sadd.s32 4294967294, %s2050_s24  }
  0x1f   : > { %2592 = sst [smem:[#allocation14_spill]] %s2050_s24  ;;  %s2191_s3 = sadd.s32 1, %s2050_s24  }
  0x20   : > { %2593 = sst [smem:[#allocation15_spill]] %s2191_s3  ;;  %s403_s26 = sadd.s32 1, %s2046_s23 }
  0x21   : > { %s400_s27 = ssub.s32 %s2050_s24, %s2191_s3  ;;  %p413_p5 = scmp.ne.s32.totalorder %s2046_s23, %s2042_s2 }
  0x22   : > { %p401_p6 = scmp.eq.s32.totalorder %s400_s27, 0  ;;  %p414_p7 = scmp.eq.s32.totalorder %s2187_s8, 3 }
  0x23   : > { %p419_p8 = scmp.ne.s32.totalorder %s2042_s2, %s2038_s22  ;;  %p420_p9 = scmp.eq.s32.totalorder %s1727_s25, 3 }
  0x24   : > { %s2202_s28 = scalar_select %p401_p6, %s2046_s23, %s403_s26  }
  0x25   : > { %p2204_p10 = por %p414_p7, %p413_p5  ;;  %p2208_p11 = por %p420_p9, %p419_p8 }
  0x26   : > { %2594 = sst [smem:[#allocation16_spill]] %s2202_s28  ;;  %p1729_p12 = scmp.ge.s32.totalorder %s2050_s24, 1 }
  0x27   : > { %s2596_s0 = scalar_select %p2208_p11, 1, 0 }
  0x28   : > { %p515_p13 = scmp.lt.s32.totalorder %s2050_s24, 5 }
  0x29   : > { %2597 = sst [smem:[#allocation17_spill]] %s2596_s0 }
  0x2a   : > { %p516_p0 = pnand %p1729_p12, %p515_p13 }
  0x2b   : > { %s2582_s30 = sand.u32 (!%p516_p0), 1, %s2042_s2   ;;  %p569_p1 = scmp.lt.s32.totalorder (!%p516_p0), %s2187_s8, 3 }
  0x2c   : > { %519 = sbr.rel (%p516_p0) target bundleno = 2939 (0xb7b), region = 88  ;;  %s2218_s20 = sshll.u32 (!%p516_p0), %s2582_s30, 1 }
  0x2d   : > { %p1733_p2 = scmp.ne.s32.totalorder (!%p516_p0), %s2187_s8, 0 }
  0x31   : > { %s570_s21 = scalar_select %p569_p1, %s2187_s8, 3 }
  0x32   : > { %578 = sbr.rel (%p1733_p2) target bundleno = 60 (0x3c), region = 92  ;;  %s2598_s0 = sld [smem:[#allocation20_spill]] (!%p1733_p2) }
  0x33   : > { %s1771_s1 = sshll.u32 %s570_s21, 2  ;;  %s2599_s24 = sld [smem:[#allocation21_spill]] (!%p1733_p2) }
  0x34   : > { %s2224_s27 = scalar_lea.vmem %s2576_s19, %s1771_s1  ;;  %s2600_s1 = sld [smem:[#allocation19_spill]] (!%p1733_p2) }
  0x37   : > { %vm580_vm0 = vcmask 254976   ;;  %vm585_vm1 = vcmask 517120   ;;  %v587_v3 = vld [vmem:[%s2564_s7] sm:$0x3]  ;;  %vm588_vm2 = vcmask 58368  }
  0x38   : > { %v579_v0 = vld [vmem:[%s2598_s0] sm:$0x3]  ;;  %589 = vst.msk [vmem:[#allocation5] sm:$0x3] %vm588_vm2, %v587_v3 }
  0x39   : > { %v582_v1 = vld [vmem:[%s2599_s24] sm:$0x3]  ;;  %581 = vst.msk [vmem:[#allocation2] sm:$0x3] %vm580_vm0, %v579_v0 }
  0x3a   : > { %583 = vst.msk [vmem:[#allocation3] sm:$0x3] %vm580_vm0, %v582_v1  ;;  %v584_v2 = vld [vmem:[%s2600_s1] sm:$0x3] }
  0x3b   : > { %586 = vst.msk [vmem:[#allocation4] sm:$0x3] %vm585_vm1, %v584_v2 }
  0x3c PF: > { %v1928_v4 = vld [vmem:[%s2567_s10 + $0x18] sm:$0xff]   ;;  %v2053_v5 = vmov 0.0   ;;  %v1929_v6 = vld [vmem:[%s2567_s10 + $0x10] sm:$0xff]   ;;  %vm2054_vm3 = vmmov 0   ;;  %s1734_s28 = sshll.u32 %s2187_s8, 7  ;;  %v1931_v7 = vld [vmem:[%s2567_s10 + $0x20] sm:$0xff]   ;;  %v738_v22 = vlaneseq }
  0x3d   : > { %1807 = vmatprep.subr.bf16.mxu1 %v2053_v5  ;;  %1801 = vmatprep.subr.bf16.mxu0 %v2053_v5  ;;  %s596_s21 = sld [smem:[#allocation7 + %s1734_s28]]  ;;  %s599_s25 = sadd.s32 1, %s1734_s28  ;;  %v1930_v8 = vld [vmem:[%s2567_s10 + $0x8] sm:$0xff]   ;;  %vm606_vm4 = vcmask 1040384   ;;  %vm626_vm5 = vcmask 130048   ;;  %v1932_v9 = vld [vmem:[%s2567_s10] sm:$0xff]  }
  0x3e   : > { %1808 = vmatpush3.bf16.msra.mxu1 %v1928_v4  ;;  %1803 = vmatprep.mubr.msk.bf16.mxu0 %vm2054_vm3, %v2053_v5  ;;  %s600_s1 = sld [smem:[#allocation7 + %s599_s25]]  ;;  %vm694_vm6 = vcmask 523264   ;;  %v1933_v15 = vld [vmem:[%s2568_s11 + $0x10] sm:$0xff]   ;;  %v1934_v18 = vld [vmem:[%s2568_s11 + $0x8] sm:$0xff]   ;;  %vm763_vm7 = vcmask 261120   ;;  %v1935_v21 = vld [vmem:[%s2568_s11] sm:$0xff]  }
  0x3f   : > { %1809 = vmatprep.subr.bf16.mxu1 %v2053_v5  ;;  %1815 = vmatprep.mubr.msk.bf16.mxu1 %vm2054_vm3, %v2053_v5  ;;  %v2295_v23 = vshrl.u32 %v738_v22, 7  ;;  %v2303_v25 = vld [vmem:[%s2574_s17] sm:$0xff]  ;;  %s2055_s30 = smov 64   ;;  %s2056_s25 = smov 32   ;;  %v1936_v58 = vld [vmem:[%s2569_s12 + $0x18] sm:$0xff]   ;;  %v1937_v59 = vld [vmem:[%s2569_s12 + $0x10] sm:$0xff]  }
  0x40   : > { %1802 = vmatpush3.bf16.msra.mxu0 %v1931_v7  ;;  %v590_v19 = vld [vmem:[#allocation2] sm:$0x3]  ;;  %v1938_v1 = vld [vmem:[%s2569_s12 + $0x8] sm:$0xff]   ;;  %vm1106_vm8 = vcmask 1041409   ;;  %vm1109_vm9 = vcmask 58368   ;;  %vm1628_vm10 = vcmask 517120  }
  0x41   : > { %1819 = vmatprep.subr.bf16.mxu0 %v2053_v5  ;;  %v750_v20 = vpack.c.bf16 %v590_v19, %v590_v19  ;;  %v2298_v24 = vsub.s32 0, %v2295_v23  ;;  %v2315_v42 = vsub.s32 1, %v2295_v23  ;;  %v591_v51 = vld [vmem:[#allocation3] sm:$0x3]  ;;  %v2058_v19 = vmov 1966171168  }
  0x42   : > { %1810 = vmatpush3.bf16.msra.mxu1 %v1929_v6  ;;  %v592_v10 = vld [vmem:[#allocation4] sm:$0x3]  ;;  %vm1272_vm11 = vcmask 785408   ;;  %vm1290_vm12 = vcmask 123904   ;;  %vm1288_vm13 = vcmask 1041408   ;;  %s2060_s23 = smov 8  }
  0x43   : > { %1811 = vmatprep.subr.bf16.mxu1 %v2053_v5  ;;  %s597_s0 = scalar_lea.vmem %s2566_s9, %s596_s21  ;;  %v618_v14 = vpack.c.bf16 %v592_v10, %v592_v10  ;;  %v741_v27 = vrot.slane %v2303_v25, %v2298_v24  ;;  %v859_v43 = vrot.slane %v2303_v25, %v2315_v42  ;;  %v1939_v2 = vld [vmem:[%s2569_s12] sm:$0xff]   ;;  %s2061_s3 = smov 9   ;;  %vm1622_vm15 = vcmask 254976  }
  0x44   : > { %v598_v11 = vld [vmem:[%s597_s0] sm:$0x1]  ;;  %s601_s26 = scalar_lea.vmem %s2566_s9, %s600_s1  ;;  %s2057_s1 = smov 96   ;;  %vm1604_vm0 = vcmask 64512   ;;  %vm1606_vm1 = vcmask 72704   ;;  %vm1608_vm2 = vcmask 138240  }
  0x45   : > { %v602_v12 = vld [vmem:[%s601_s26] sm:$0x1]  ;;  %s2601_s26 = sld [smem:[#allocation22_spill]]  ;;  %s2604_s28 = sand.u32 1, %s2042_s2  }
  0x46   : > { %1812 = vmatpush3.bf16.msra.mxu1 %v1930_v8  ;;  %v604_v13 = vrot.slane %v602_v12, 7  ;;  %v1940_v12 = vld [vmem:[%s2572_s15 + $0x8] sm:$0xff]   ;;  %s1632_s0 = scalar_lea.sflag [#allocation9], %s2604_s28 }
  0x47   : > { %1813 = vmatprep.subr.bf16.mxu1 %v2053_v5 }
  0x48   : > { %v607_v16 = vsel %vm606_vm4, %v598_v11, %v604_v13 }
  0x49   : > { %v619_v17 = vpack.c.bf16 %v607_v16, %v607_v16 }
  0x4a   : > { %1814 = vmatpush3.bf16.msra.mxu1 %v1932_v9  ;;  %v2353_v9 = vld [vmem:[#allocation5] sm:$0x3] }
  0x4b   : > { %1833 = vmatprep.subr.bf16.mxu1 %v2053_v5  ;;  %1804 = vmatmul.mubr.msk.bf16.vlgmr.msra.gmra.mxu0 %vm626_vm5, %v619_v17  ;;  %v1061_v10 = vrot.slane %v2353_v9, %v2298_v24  ;;  %v1068_v11 = vrot.slane %v2353_v9, %v2315_v42 }
  0x4c   : > { %1820 = vmatpush3.bf16.msra.mxu0 %v1933_v15  ;;  %1823 = vmatprep.mubr.msk.bf16.mxu0 %vm2054_vm3, %v2053_v5 }
  0x4d   : > { %1816 = vmatmul.mubr.msk.bf16.vlgmr.msra.gmra.mxu1 %vm694_vm6, %v618_v14  ;;  %1821 = vmatprep.subr.bf16.mxu0 %v2053_v5  ;;  %v1941_v14 = vld [vmem:[%s2572_s15] sm:$0xff]  }
  0x4e   : > { %1837 = vmatprep.mubr.msk.bf16.mxu1 %vm2054_vm3, %v2053_v5  ;;  %1834 = vmatpush3.bf16.msra.mxu1 %v1936_v58 }
  0x4f   : > { %1835 = vmatprep.subr.bf16.mxu1 %v2053_v5 }
  0x50   : > { %1822 = vmatpush3.bf16.msra.mxu0 %v1934_v18 }
  0x51   : > { %1827 = vmatprep.subr.bf16.mxu0 %v2053_v5 }
  0x52   : > { %1836 = vmatpush3.bf16.msra.mxu1 %v1937_v59 }
  0x53   : > { %1824 = vmatmul.mubr.msk.bf16.vlgmr.msra.gmra.mxu0 %vm763_vm7, %v750_v20  ;;  %1849 = vmatprep.subr.bf16.mxu1 %v2053_v5  ;;  %v1025_v20 = vunpack.c.l.s4 %v2058_v19 }
  0x54   : > { %1829 = vmatprep.mubr.msk.bf16.mxu0 %vm2054_vm3, %v2053_v5  ;;  %1828 = vmatpush3.bf16.msra.mxu0 %v1935_v21  ;;  %v1017_v21 = vsub.s32 2, %v2295_v23 }
  0x55   : > { %1841 = vmatprep.subr.bf16.mxu0 %v2053_v5 }
 0x10b   : > { %v664_v28 = vpop.f32.mrf.mxu0 }
 0x10d   : > { %v732_v26 = vpop.f32.mrf.mxu1  ;;  %v1805_v31 = vpop.f32.mrf.mxu0 }
 0x10e   : > { %v733_v29 = vadd.f32 %v732_v26, %v664_v28  ;;  %v1026_v26 = vunpack.c.0.s8 %v1025_v20 }
 0x10f   : > { %v1817_v30 = vpop.f32.mrf.mxu1  ;;  %v667_v34 = vpop.f32.mrf.mxu0 }
 0x110   : > { %v2307_v32 = vadd.f32 %v741_v27, %v733_v29  ;;  %v1018_v27 = vrot.slane %v2303_v25, %v1017_v21  ;;  %v1029_v30 = vsub.s32 %v1026_v26, %v2295_v23 }
 0x111   : > { %v735_v33 = vpop.f32.mrf.mxu1  ;;  %v1806_v37 = vpop.f32.mrf.mxu0 }
 0x112   : > { %v749_v35 = vpack.c.bf16 %v2307_v32, %v2307_v32  ;;  %v1020_v33 = vld [vmem:[%s2570_s13] sm:$0x3] }
 0x113   : > { %v1818_v36 = vpop.f32.mrf.mxu1  ;;  %v801_v38 = vpop.f32.mrf.mxu0  ;;  %v1075_v37 = vrot.slane %v1020_v33, %v2298_v24  ;;  %v1085_v59 = vrot.slane %v1020_v33, %v2315_v42 }
 0x114   : > { %1830 = vmatmul.mubr.msk.bf16.vlgmr.msra.gmra.mxu0 %vm626_vm5, %v749_v35 }
 0x115   : > { %1845 = vmatprep.mubr.msk.bf16.mxu0 %vm2054_vm3, %v2053_v5  ;;  %v1825_v39 = vpop.f32.mrf.mxu0  ;;  %1842 = vmatpush3.bf16.msra.mxu0 %v1938_v1 }
 0x116   : > { %1843 = vmatprep.subr.bf16.mxu0 %v2053_v5 }
 0x117   : > { %v804_v40 = vpop.f32.mrf.mxu0 }
 0x119   : > { %v1826_v41 = vpop.f32.mrf.mxu0  ;;  %1844 = vmatpush3.bf16.msra.mxu0 %v1939_v2 }
 0x11a   : > { %1861 = vmatprep.subr.bf16.mxu0 %v2053_v5 }
 0x1d4   : > { %v850_v44 = vpop.f32.mrf.mxu0 }
 0x1d5   : > { %v851_v45 = vadd.f32 %v850_v44, %v801_v38  ;;  %v1021_v44 = vld [vmem:[%s2562_s5] sm:$0xff] }
 0x1d6   : > { %v1831_v46 = vpop.f32.mrf.mxu0 }
 0x1d7   : > { %v860_v47 = vadd.f32 %v859_v43, %v851_v45 }
 0x1d8   : > { %v853_v48 = vpop.f32.mrf.mxu0 }
 0x1d9   : > { %1948 = vtanh.f32 %v860_v47  ;;  %v1747_v52 = vmul.f32 -1.442695, %v860_v47 }
 0x1da   : > { %v1832_v49 = vpop.f32.mrf.mxu0 }
 0x1db   : > { %1950 = vpow2.f32 %v1747_v52 }
 0x1e6   : > { %v1949_v50 = vpop.eup %1948 }
 0x1e7   : > { %874 = vrot.lane.b32.xlu0 %v1949_v50, %s2055_s30  ;;  %v1022_v50 = vld [vmem:[%s2562_s5 + $0x8] sm:$0xff] }
 0x1e8   : > { %v1951_v53 = vpop.eup %1950 }
 0x1e9   : > { %v864_v54 = vadd.f32 1.0, %v1951_v53 }
 0x1eb   : > { %869 = vrot.lane.b32.xlu0 %v591_v51, %s2056_s25  ;;  %1952 = vrcp.f32 %v864_v54 }
 0x1f8   : > { %v1953_v55 = vpop.eup %1952 }
 0x259   : > { %v875_v56 = vpop.permute.xlu0 %874 }
 0x25a   : > { %v877_v57 = vmul.f32 %v1953_v55, %v875_v56 }
 0x25c   : > { %879 = vrot.lane.b32.xlu1 %v877_v57, %s2056_s25 }
 0x25d   : > { %v870_v60 = vpop.permute.xlu0 %869 }
 0x25e   : > { %v872_v61 = vmul.f32 %v1953_v55, %v870_v60 }
 0x2ce   : > { %v880_v62 = vpop.permute.xlu1 %879 }
 0x2cf   : > { %v2330_v63 = vadd.f32 %v880_v62, %v872_v61 }
 0x2d1   : > { %1954 = vtanh.f32 %v2330_v63  ;;  %v898_v0 = vpack.c.bf16 %v2330_v63, %v2330_v63 }
 0x2d3   : > { %900 = vrot.lane.b32.xlu0 %v898_v0, %s2057_s1 }
 0x2d7   : > { %1063 = vbcast.lane.b32.xlu0 %v1061_v10, 256 }
 0x2de   : > { %v1955_v3 = vpop.eup %1954 }
 0x2df   : > { %885 = vrot.lane.b32.xlu1 %v1955_v3, %s2055_s30  ;;  %v2394_v3 = vand.u32 127, %v738_v22 }
 0x345   : > { %v901_v4 = vpop.permute.xlu0 %900 }
 0x346   : > { %1838 = vmatmul.mubr.msk.bf16.vlgmr.msra.gmra.mxu1 %vm763_vm7, %v901_v4  ;;  %v2398_v4 = vsub.s32 %v2394_v3, %v2295_v23 }
 0x347   : > { %1857 = vmatprep.mubr.msk.bf16.mxu1 %vm2054_vm3, %v2053_v5 }
 0x349   : > { %v1064_v39 = vpop.permute.xlu0 %1063 }
 0x34a   : > { %v1076_v47 = vmul.f32 %v1075_v37, %v1064_v39 }
 0x351   : > { %v886_v6 = vpop.permute.xlu1 %885 }
 0x352   : > { %v2348_v7 = vmul.f32 %v1953_v55, %v886_v6 }
 0x354   : > { %v897_v8 = vpack.c.bf16 %v2348_v7, %v2348_v7 }
 0x356   : > { %958 = vrot.lane.b32.xlu1 %v897_v8, %s2056_s25 }
 0x35a   : > { %1070 = vbcast.lane.b32.xlu1 %v1068_v11, 256 }
 0x3c8   : > { %v959_v13 = vpop.permute.xlu1 %958 }
 0x3c9   : > { %1846 = vmatmul.mubr.msk.bf16.vlgmr.msra.gmra.mxu0 %vm763_vm7, %v959_v13 }
 0x3ca   : > { %1862 = vmatpush3.bf16.msra.mxu0 %v1940_v12  ;;  %1865 = vmatprep.mubr.msk.bf16.mxu0 %vm2054_vm3, %v2053_v5 }
 0x3cb   : > { %1863 = vmatprep.subr.bf16.mxu0 %v2053_v5 }
 0x3cc   : > { %v1071_v45 = vpop.permute.xlu1 %1070 }
 0x3cd   : > { %v1077_v53 = vmul.f32 %v1075_v37, %v1071_v45 }
 0x3ce   : > { %1864 = vmatpush3.bf16.msra.mxu0 %v1941_v14  ;;  %v2059_v14 = vmov 0  }
 0x3cf   : > { %1869 = vmatprep.subr.bf16.mxu0 %v2053_v5  ;;  %1927 = vset.pattern.permute.xlu1 %v2059_v14 }
 0x3d0   : > { %1926 = vset.pattern.permute.xlu0 %v2059_v14 }
 0x3d1   : > { %1866 = vmatmul.mubr.msk.bf16.vlgmr.msra.gmra.mxu0 %vm763_vm7, %v959_v13 }
 0x3d2   : > { %1873 = vmatprep.mubr.msk.bf16.mxu0 %vm2054_vm3, %v2053_v5 }
 0x406   : > { %v951_v15 = vpop.f32.mrf.mxu1 }
 0x408   : > { %v1839_v16 = vpop.f32.mrf.mxu1 }
 0x40a   : > { %v954_v17 = vpop.f32.mrf.mxu1 }
 0x40c   : > { %v1840_v18 = vpop.f32.mrf.mxu1 }
 0x489   : > { %v1009_v28 = vpop.f32.mrf.mxu0 }
 0x48a   : > { %v1010_v29 = vadd.f32 %v1009_v28, %v951_v15 }
 0x48b   : > { %v1847_v31 = vpop.f32.mrf.mxu0 }
 0x48c   : > { %v1019_v34 = vadd.f32 %v1018_v27, %v1010_v29  ;;  %v1165_v27 = vld [vmem:[%s2563_s6] sm:$0x3] }
 0x48d   : > { %v1012_v35 = vpop.f32.mrf.mxu0  ;;  %v1170_v28 = vrot.slane %v1165_v27, %v2298_v24  ;;  %v1177_v29 = vrot.slane %v1165_v27, %v2315_v42 }
 0x48e   : > { %v1030_v36 = vrot.slane %v1019_v34, %v1029_v30 }
 0x48f   : > { %v1848_v38 = vpop.f32.mrf.mxu0 }
 0x490   : > { %v1031_v40 = vcombine.high %v1030_v36, %v1030_v36  ;;  %v1038_v41 = vrot.slane %v1030_v36, %v1029_v30 }
 0x491   : > { %v2380_v43 = vpop.f32.mrf.mxu0 }
 0x492   : > { %v1049_v46 = vrot.slane %v1038_v41, %v2298_v24  ;;  %v1045_v48 = vrot.slane %v1031_v40, %v1029_v30 }
 0x493   : > { %v1867_v49 = vpop.f32.mrf.mxu0 }
 0x494   : > { %v1056_v51 = vadd.f32 %v1049_v46, %v1021_v44  ;;  %v1053_v52 = vrot.slane %v1045_v48, %v2298_v24 }
 0x495   : > { %v1442_v54 = vpop.f32.mrf.mxu0 }
 0x496   : > { %v1078_v55 = vadd.f32 %v1076_v47, %v1056_v51  ;;  %v1057_v56 = vadd.f32 %v1053_v52, %v1022_v50 }
 0x497   : > { %v1868_v57 = vpop.f32.mrf.mxu0 }
 0x498   : > { %1956 = vtanh.f32 %v1078_v55  ;;  %v1079_v58 = vadd.f32 %v1077_v53, %v1057_v56 }
 0x49a   : > { %1958 = vtanh.f32 %v1079_v58 }
 0x4a5   : > { %v1957_v60 = vpop.eup %1956 }
 0x4a6   : > { %v1086_v61 = vmul.f32 %v1957_v60, %v1085_v59 }
 0x4a7   : > { %v1959_v62 = vpop.eup %1958 }
 0x4a8   : > { %v1088_v0 = vsel %vm694_vm6, %v1086_v61, 0.0  ;;  %v1087_v1 = vmul.f32 %v1959_v62, %v1085_v59  ;;  %v1942_v61 = vld [vmem:[%s2572_s15 + $0x28] sm:$0xff]   ;;  %v1943_v62 = vld [vmem:[%s2572_s15 + $0x20] sm:$0xff]  }
 0x4a9   : > { %1089 = vadd.xlane.f32.xlu0 %v1088_v0  ;;  %1850 = vmatpush3.bf16.msra.mxu1 %v1942_v61  ;;  %v1944_v0 = vld [vmem:[%s2572_s15 + $0x18] sm:$0xff]  }
 0x4aa   : > { %v1091_v2 = vsel %vm694_vm6, %v1087_v1, 0.0  ;;  %1851 = vmatprep.subr.bf16.mxu1 %v2053_v5  ;;  %v1945_v1 = vld [vmem:[%s2572_s15 + $0x10] sm:$0xff]  }
 0x4ab   : > { %1092 = vadd.xlane.f32.xlu1 %v1091_v2  ;;  %v1220_v2 = vld [vmem:[%s2561_s4] sm:$0xff] }
 0x4ad   : > { %1852 = vmatpush3.bf16.msra.mxu1 %v1943_v62 }
 0x4ae   : > { %1853 = vmatprep.subr.bf16.mxu1 %v2053_v5 }
 0x4b1   : > { %1854 = vmatpush3.bf16.msra.mxu1 %v1944_v0 }
 0x4b2   : > { %1855 = vmatprep.subr.bf16.mxu1 %v2053_v5 }
 0x4b5   : > { %1856 = vmatpush3.bf16.msra.mxu1 %v1945_v1 }
 0x532   : > { %v1090_v6 = vpop.xlane.xlu0 %1089 }
 0x533   : > { %v1101_v10 = vrot.slane %v1090_v6, %v2398_v4 }
 0x534   : > { %v1093_v8 = vpop.xlane.xlu1 %1092 }
 0x535   : > { %v1105_v11 = vrot.slane %v1093_v8, %v2398_v4 }
 0x537   : > { %v1107_v12 = vsel %vm1106_vm8, %v1105_v11, %v1101_v10  ;;  %v1221_v10 = vld [vmem:[%s2561_s4 + $0x8] sm:$0xff] }
 0x538   : > { %v1110_v13 = vsel %vm1109_vm9, %v1107_v12, -inf }
 0x539   : > { %1111 = vmax.xlane.f32.xlu0 %v1110_v13 }
 0x5c2   : > { %v1112_v22 = vpop.xlane.xlu0 %1111 }
 0x5c3   : > { %v1117_v15 = vrot.slane %v1112_v22, %v2298_v24  ;;  %v1121_v16 = vrot.slane %v1112_v22, %v2315_v42 }
 0x5c5   : > { %v1124_v17 = vsub.f32 %v1090_v6, %v1117_v15  ;;  %v1125_v18 = vsub.f32 %v1093_v8, %v1121_v16 }
 0x5c7   : > { %v1126_v19 = vmul.f32 1.442695, %v1124_v17  ;;  %v1128_v20 = vmul.f32 1.442695, %v1125_v18 }
 0x5c9   : > { %1960 = vpow2.f32 %v1126_v19 }
 0x5ca   : > { %1962 = vpow2.f32 %v1128_v20 }
 0x5d6   : > { %v1961_v21 = vpop.eup %1960 }
 0x5d7   : > { %v1963_v26 = vpop.eup %1962  ;;  %1133 = vperm.xlu0 %1926, %v1961_v21  }
 0x5d8   : > { %1136 = vperm.xlu1 %1927, %v1963_v26  }
 0x5db   : > { %1172 = vbcast.lane.b32.xlu0 %v1170_v28, 256 }
 0x5df   : > { %1179 = vbcast.lane.b32.xlu0 %v1177_v29, 256 }
 0x652   : > { %v1134_v30 = vpop.permute.xlu0 %1133 }
 0x653   : > { %v1137_v31 = vpop.permute.xlu1 %1136  ;;  %v1141_v33 = vrot.slane %v1134_v30, %v2398_v4 }
 0x654   : > { %v1145_v34 = vrot.slane %v1137_v31, %v2398_v4  ;;  %v1274_v31 = vld [vmem:[%s2571_s14] sm:$0x3] }
 0x656   : > { %v1146_v35 = vsel %vm1106_vm8, %v1145_v34, %v1141_v33  ;;  %v1173_v38 = vpop.permute.xlu0 %1172 }
 0x657   : > { %v1148_v36 = vsel %vm1109_vm9, %v1146_v35, 0.0  ;;  %v1283_v35 = vrot.slane %v1274_v31, %v2315_v42 }
 0x658   : > { %1149 = vadd.xlane.f32.xlu1 %v1148_v36 }
 0x65a   : > { %v1180_v44 = vpop.permute.xlu0 %1179 }
 0x6e1   : > { %v1150_v37 = vpop.xlane.xlu1 %1149 }
 0x6e2   : > { %1964 = vrcp.f32 %v1150_v37  ;;  %v1279_v37 = vrot.slane %v1274_v31, %v2298_v24 }
 0x6ef   : > { %v1965_v39 = vpop.eup %1964 }
 0x6f0   : > { %v1156_v40 = vrot.slane %v1965_v39, %v2298_v24  ;;  %v1160_v41 = vrot.slane %v1965_v39, %v2315_v42 }
 0x6f2   : > { %v1163_v45 = vmul.f32 %v1961_v21, %v1156_v40  ;;  %v1164_v46 = vmul.f32 %v1963_v26, %v1160_v41 }
 0x6f4   : > { %v1183_v47 = vmul.f32 %v1173_v38, %v1163_v45  ;;  %v1184_v48 = vmul.f32 %v1180_v44, %v1164_v46  ;;  %v1287_v44 = vmul.f32 %v1283_v35, %v2307_v32  ;;  %v1946_v32 = vld [vmem:[%s2573_s16 + $0x8] sm:$0xff]  }
 0x6f5   : > { %1870 = vmatpush3.bf16.msra.mxu0 %v1946_v32 }
 0x6f6   : > { %1188 = vperm.xlu0 %1926, %v1183_v47   ;;  %1191 = vperm.xlu1 %1927, %v1184_v48  }
 0x6f7   : > { %1871 = vmatprep.subr.bf16.mxu0 %v2053_v5  ;;  %v1447_v5 = vsub.s32 4, %v2295_v23 }
 0x6f9   : > { %v1448_v1 = vrot.slane %v2303_v25, %v1447_v5 }
 0x771   : > { %v1192_v49 = vpop.permute.xlu1 %1191  ;;  %v1189_v50 = vpop.permute.xlu0 %1188 }
 0x772   : > { %v1200_v51 = vrot.slane %v1192_v49, %v2398_v4  ;;  %v1196_v52 = vrot.slane %v1189_v50, %v2398_v4 }
 0x774   : > { %v1201_v53 = vsel %vm1106_vm8, %v1200_v51, %v1196_v52  ;;  %v1291_v52 = vsel %vm1290_vm12, %v1287_v44, 0.0 }
 0x775   : > { %v1203_v54 = vsel %vm1109_vm9, %v1201_v53, 0.0 }
 0x776   : > { %1204 = vadd.xlane.f32.xlu0 %v1203_v54  ;;  %v1947_v54 = vld [vmem:[%s2573_s16] sm:$0xff]  }
 0x777   : > { %1872 = vmatpush3.bf16.msra.mxu0 %v1947_v54 }
 0x7ff   : > { %v1205_v55 = vpop.xlane.xlu0 %1204 }
 0x800   : > { %1966 = vrcp.f32 %v1205_v55  ;;  %v1297_v55 = vsub.s32 3, %v2295_v23 }
 0x80d   : > { %v1967_v56 = vpop.eup %1966 }
 0x80e   : > { %v1211_v57 = vrot.slane %v1967_v56, %v2298_v24  ;;  %v1215_v59 = vrot.slane %v1967_v56, %v2315_v42  ;;  %v1298_v56 = vrot.slane %v2303_v25, %v1297_v55 }
 0x810   : > { %v1218_v58 = vmul.f32 %v1211_v57, %v1183_v47  ;;  %v1219_v60 = vmul.f32 %v1215_v59, %v1184_v48 }
 0x812   : > { %1224 = vperm.xlu1 %1927, %v1218_v58  }
 0x816   : > { %1229 = vperm.xlu1 %1927, %v1219_v60  }
 0x81a   : > { %1264 = vrot.lane.b32.xlu1 %v2348_v7, %s2057_s1 }
 0x81e   : > { %1268 = vrot.lane.b32.xlu1 %v2330_v63, %s2055_s30 }
 0x88d   : > { %v1225_v6 = vpop.permute.xlu1 %1224 }
 0x88e   : > { %v1232_v8 = vmul.f32 %v1225_v6, %v1220_v2  ;;  %v1251_v14 = vrot.slane %v1225_v6, %v2398_v4 }
 0x890   : > { %v1234_v11 = vsel %vm694_vm6, %v1232_v8, 0.0 }
 0x891   : > { %v1235_v12 = vrot.slane %v1234_v11, 4  ;;  %v1230_v13 = vpop.permute.xlu1 %1229 }
 0x892   : > { %v1233_v22 = vmul.f32 %v1230_v13, %v1221_v10  ;;  %v1255_v15 = vrot.slane %v1230_v13, %v2398_v4 }
 0x893   : > { %v1236_v16 = vadd.f32 %v1235_v12, %v1234_v11 }
 0x894   : > { %v1241_v17 = vsel %vm694_vm6, %v1233_v22, 0.0  ;;  %v2453_v18 = vsel %vm1106_vm8, %v1255_v15, %v1251_v14  ;;  %v1457_v14 = vsub.s32 5, %v2295_v23 }
 0x895   : > { %v1237_v19 = vrot.slane %v1236_v16, 2  ;;  %v1242_v20 = vrot.slane %v1241_v17, 4  ;;  %v2457_v21 = vadd.f32 %v2453_v18, %v2353_v9  ;;  %v1265_v33 = vpop.permute.xlu1 %1264 }
 0x896   : > { %v1458_v22 = vrot.slane %v2303_v25, %v1457_v14 }
 0x897   : > { %v1238_v26 = vadd.f32 %v1237_v19, %v1236_v16  ;;  %v1243_v27 = vadd.f32 %v1242_v20, %v1241_v17  ;;  %1630 = vst.msk [vmem:[#allocation5] sm:$0x3] %vm1109_vm9, %v2457_v21 }
 0x899   : > { %v1239_v28 = vrot.slane %v1238_v26, 1  ;;  %v1244_v29 = vrot.slane %v1243_v27, 2  ;;  %v1269_v41 = vpop.permute.xlu1 %1268 }
 0x89b   : > { %v1245_v4 = vadd.f32 %v1244_v29, %v1243_v27  ;;  %v1240_v30 = vadd.f32 %v1239_v28, %v1238_v26 }
 0x89d   : > { %v1246_v34 = vrot.slane %v1245_v4, 1  ;;  %v1318_v9 = vpack.c.bf16 %v1240_v30, %v1240_v30 }
 0x89f   : > { %v1247_v36 = vadd.f32 %v1246_v34, %v1245_v4  ;;  %v1322_v45 = vunpack.c.l.b16 %v1318_v9 }
 0x8a1   : > { %v2467_v38 = vsel %vm1106_vm8, %v1247_v36, %v1240_v30  ;;  %v1319_v39 = vpack.c.bf16 %v1247_v36, %v1247_v36 }
 0x8a2   : > { %1629 = vst.msk [vmem:[#allocation4] sm:$0x3] %vm1628_vm10, %v2467_v38  ;;  %v1271_v40 = vsel %vm694_vm6, %v2467_v38, %v1265_v33 }
 0x8a3   : > { %v1323_v46 = vunpack.c.l.b16 %v1319_v39  ;;  %v1273_v47 = vsel %vm1272_vm11, %v1271_v40, %v1269_v41 }
 0x8a4   : > { %v1286_v48 = vmul.f32 %v1279_v37, %v1273_v47 }
 0x8a5   : > { %v1324_v49 = vsel %vm1106_vm8, %v1323_v46, %v1322_v45 }
 0x8a6   : > { %v1325_v50 = vpack.c.b16 %v1324_v49, %v1324_v49  ;;  %v1289_v51 = vsel %vm1288_vm13, %v1286_v48, 0.0 }
 0x8a7   : > { %v1292_v53 = vadd.f32 %v1291_v52, %v1289_v51 }
 0x8a8   : > { %1858 = vmatmul.mubr.msk.bf16.vlgmr.msra.gmra.mxu1 %vm694_vm6, %v1325_v50 }
 0x8a9   : > { %1293 = vadd.xlane.f32.xlu0 %v1292_v53 }
 0x932   : > { %v1294_v57 = vpop.xlane.xlu0 %1293 }
 0x933   : > { %v1299_v58 = vadd.f32 %v1298_v56, %v1294_v57 }
 0x935   : > { %v1754_v59 = vmul.f32 -1.442695, %v1299_v58 }
 0x937   : > { %1968 = vpow2.f32 %v1754_v59 }
 0x944   : > { %v1969_v60 = vpop.eup %1968 }
 0x945   : > { %v1303_v61 = vadd.f32 1.0, %v1969_v60 }
 0x947   : > { %1970 = vrcp.f32 %v1303_v61 }
 0x954   : > { %v1971_v62 = vpop.eup %1970 }
 0x955   : > { %v1525_v0 = vsub.f32 1.0, %v1971_v62 }
 0x957   : > { %1528 = vperm.xlu0 %1926, %v1525_v0  }
 0x968   : > { %v1387_v2 = vpop.f32.mrf.mxu1 }
 0x969   : > { %v1440_v6 = vadd.f32 %v2380_v43, %v1387_v2  ;;  %v1532_v43 = vld [vmem:[%s2601_s26] sm:$0x3] }
 0x96a   : > { %v1859_v8 = vpop.f32.mrf.mxu1  ;;  %v1536_v27 = vrot.slane %v1532_v43, %v2298_v24  ;;  %v1543_v23 = vrot.slane %v1532_v43, %v2315_v42 }
 0x96b   : > { %v1449_v10 = vadd.f32 %v1448_v1, %v1440_v6 }
 0x96c   : > { %v1390_v11 = vpop.f32.mrf.mxu1 }
 0x96d   : > { %v1450_v12 = vpack.c.bf16 %v1449_v10, %v1449_v10 }
 0x96e   : > { %v1860_v13 = vpop.f32.mrf.mxu1 }
 0x96f   : > { %1874 = vmatmul.mubr.msk.bf16.vlgmr.msra.gmra.mxu0 %vm763_vm7, %v1450_v12 }
 0x9d2   : > { %v1529_v28 = vpop.permute.xlu0 %1528 }
 0x9d3   : > { %v1531_v25 = vmul.f32 %v1529_v28, %v2453_v18 }
 0x9d5   : > { %v1559_v29 = vrot.slane %v1531_v25, %v2315_v42  ;;  %v1552_v48 = vrot.slane %v1531_v25, %v2298_v24 }
 0xa2f   : > { %v1508_v15 = vpop.f32.mrf.mxu0 }
 0xa30   : > { %v1509_v16 = vadd.f32 %v1508_v15, %v1458_v22 }
 0xa31   : > { %v1875_v17 = vpop.f32.mrf.mxu0 }
 0xa32   : > { %v1514_v19 = vsel %vm1288_vm13, %v1509_v16, -inf }
 0xa33   : > { %1515 = vmax.xlane.f32.xlu1 %v1514_v19  ;;  %v1511_v20 = vpop.f32.mrf.mxu0 }
 0xa35   : > { %v1876_v26 = vpop.f32.mrf.mxu0 }
 0xa44   : > { %1538 = vbcast.lane.b32.xlu1 %v1536_v27, 256 }
 0xa48   : > { %1545 = vbcast.lane.b32.xlu1 %v1543_v23, 256 }
 0xa4c   : > { %1561 = vbcast.lane.b32.xlu1 %v1559_v29, 256 }
 0xa50   : > { %1579 = vperm.xlu1 %1927, %v1971_v62  }
 0xa54   : > { %1595 = vrot.lane.b32.xlu1 %v1971_v62, %s2060_s23 }
 0xa58   : > { %1589 = vrot.lane.b32.xlu1 %v2348_v7, %s2056_s25 }
 0xa5c   : > { %1599 = vrot.lane.b32.xlu1 %v2457_v21, %s2061_s3 }
 0xa60   : > { %1592 = vrot.lane.b32.xlu1 %v2467_v38, %s2055_s30  ;;  %s2602_s30 = scalar_lea.vmem [#allocation8], %s2218_s20 }
 0xa61   : > { %s1650_s25 = sshll.u32 %s2602_s30, 4  ;;  %s2603_s24 = smov %s2602_s30  ;;  %s1651_s25 = int_to_ptr.vmem [resolvable:$true] %s1650_s25 }
 0xa62   : > { %s1988_s26 = scalar_lea.vmem %s1651_s25, 32 }
 0xa63   : > { %p1989_p3 = scmp.ne.s32.totalorder %s1651_s25, %s1988_s26 }
 0xa65   : > { %p1990_p4 = pnand %p1989_p3, %p2204_p10 }
 0xa67   : > { %p1991_p5 = pneg %p1990_p4 }
 0xabc   : > { %v1516_v4 = vpop.xlane.xlu1 %1515 }
 0xabd   : > { %v1517_v30 = vsub.f32 %v1509_v16, %v1516_v4 }
 0xabf   : > { %v1518_v31 = vmul.f32 1.442695, %v1517_v30 }
 0xac0   : > { %v1539_v33 = vpop.permute.xlu1 %1538 }
 0xac1   : > { %1972 = vpow2.f32 %v1518_v31  ;;  %vm1547_vm3 = vcmp.eq.s32.totalorder %v2394_v3, %v1539_v33 }
 0xac4   : > { %v1546_v34 = vpop.permute.xlu1 %1545 }
 0xac5   : > { %vm1548_vm14 = vcmp.eq.s32.totalorder %v2394_v3, %v1546_v34 }
 0xac8   : > { %v1562_v42 = vpop.permute.xlu1 %1561 }
 0xac9   : > { %v1564_v35 = vsel %vm1548_vm14, %v1562_v42, 0.0 }
 0xaca   : > { %v1571_v49 = vrot.slane %v1564_v35, 4 }
 0xacc   : > { %v1580_v36 = vpop.permute.xlu1 %1579  ;;  %v1572_v50 = vadd.f32 %v1571_v49, %v1564_v35 }
 0xace   : > { %v1973_v9 = vpop.eup %1972  ;;  %v1573_v51 = vrot.slane %v1572_v50, 2 }
 0xacf   : > { %v1520_v7 = vsel %vm1288_vm13, %v1973_v9, 0.0 }
 0xad0   : > { %1521 = vadd.xlane.f32.xlu0 %v1520_v7  ;;  %v1596_v21 = vpop.permute.xlu1 %1595  ;;  %v1574_v54 = vadd.f32 %v1573_v51, %v1572_v50 }
 0xad1   : > { %v1605_v39 = vsel %vm1604_vm0, %v2453_v18, %v1596_v21 }
 0xad4   : > { %v1590_v37 = vpop.permute.xlu1 %1589 }
 0xad5   : > { %1623 = vst.msk [vmem:[#allocation2] sm:$0x3] %vm1622_vm15, %v1590_v37  ;;  %v1602_v41 = vsel %vm763_vm7, %v1590_v37, %v2330_v63 }
 0xad8   : > { %v1600_v38 = vpop.permute.xlu1 %1599 }
 0xad9   : > { %v1607_v40 = vsel %vm1606_vm1, %v1605_v39, %v1600_v38 }
 0xada   : > { %v1609_v45 = vsel %vm1608_vm2, %v1607_v40, 0.0 }
 0xadc   : > { %v1593_v44 = vpop.permute.xlu1 %1592 }
 0xadd   : > { %v1603_v46 = vsel %vm694_vm6, %v1602_v41, %v1593_v44 }
 0xade   : > { %v1612_v47 = vcombine.low %v1603_v46, %v1609_v45 }
 0xae0   : > { %1766 = vst.sshfl [vmem:[%s2224_s27] sm:$0x33 pattern:$0x76325410] %v1612_v47  ;;  %s1768_s27 = sshll.u32 %s2187_s8, 5  ;;  %s2062_s8 = smov [#allocation8]  }
 0xae1   : > { %s1648_s22 = scalar_lea.hbm %s2575_s18, %s1768_s27  ;;  %s1992_s23 = sshll.u32 %s2062_s8, 4  ;;  %s1993_s23 = int_to_ptr.vmem [resolvable:$false] %s1992_s23 }
 0xae2   : > { %s1994_s3 = scalar_lea.vmem %s1993_s23, 64  ;;  %p1995_p6 = scmp.lt.s32.totalorder %s1651_s25, %s1993_s23 }
 0xae3   : > { %p1996_p7 = scmp.lt.s32.totalorder %s1994_s3, %s1988_s26 }
 0xae5   : > { %p1997_p8 = por %p1996_p7, %p1995_p6 }
 0xae6   : > { %1554 = vbcast.lane.b32.xlu0 %v1552_v48, 256 }
 0xae7   : > { %p1998_p9 = pnand %p1997_p8, %p1991_p5 }
 0xaea   : > { %1624 = vrot.lane.b32.xlu0 %v2330_v63, %s2057_s1  ;;  %v1575_v63 = vrot.slane %v1574_v54, 1 }
 0xaec   : > { %v1576_v60 = vadd.f32 %v1575_v63, %v1574_v54 }
 0xb59   : > { %v1522_v18 = vpop.xlane.xlu0 %1521 }
 0xb5a   : > { %1974 = vrcp.f32 %v1522_v18 }
 0xb5d   : > { %v1555_v52 = vpop.permute.xlu0 %1554 }
 0xb5e   : > { %v1563_v53 = vsel %vm1547_vm3, %v1555_v52, 0.0 }
 0xb5f   : > { %v1565_v32 = vrot.slane %v1563_v53, 4 }
 0xb61   : > { %v1566_v55 = vadd.f32 %v1565_v32, %v1563_v53  ;;  %v1625_v56 = vpop.permute.xlu0 %1624 }
 0xb62   : > { %1627 = vst.msk [vmem:[#allocation3] sm:$0x3] %vm1622_vm15, %v1625_v56 }
 0xb63   : > { %v1567_v24 = vrot.slane %v1566_v55, 2 }
 0xb65   : > { %v1568_v57 = vadd.f32 %v1567_v24, %v1566_v55 }
 0xb67   : > { %v1975_v58 = vpop.eup %1974  ;;  %v1569_v59 = vrot.slane %v1568_v57, 1 }
 0xb68   : > { %v1524_v3 = vmul.f32 %v1975_v58, %v1973_v9 }
 0xb69   : > { %v1570_v61 = vadd.f32 %v1569_v59, %v1568_v57 }
 0xb6a   : > { %v1582_v62 = vmul.f32 %v1580_v36, %v1524_v3 }
 0xb6b   : > { %v1585_v0 = vsel %vm1106_vm8, %v1576_v60, %v1570_v61 }
 0xb6c   : > { %v1587_v5 = vadd.f32 %v1585_v0, %v1582_v62 }
 0xb6e   : > { %1588 = vst [vmem:[%s2603_s24] sm:$0x3] %v1587_v5 }
 0xb6f   : > { %2001 = shalt.err (!%p1998_p9)
}
 0xb70   : > { %s2002_s27 = scalar_lea.hbm %s1648_s22, 32  ;;  %s2006_s1 = scalar_lea.hbm %s2575_s18, 128 }
 0xb71   : > { %p2003_p12 = scmp.ne.s32.totalorder %s1648_s22, %s2002_s27  ;;  %p2007_p1 = scmp.lt.s32.totalorder %s1648_s22, %s2575_s18 }
 0xb72   : > { %p2008_p2 = scmp.lt.s32.totalorder %s2006_s1, %s2002_s27 }
 0xb73   : > { %p2004_p13 = pnand %p2003_p12, %p2204_p10 }
 0xb74   : > { %p2009_p3 = por %p2008_p2, %p2007_p1 }
 0xb75   : > { %p2005_p0 = pneg %p2004_p13 }
 0xb77   : > { %p2010_p4 = pnand %p2009_p3, %p2005_p0 }
 0xb79   : > { %2013 = shalt.err (!%p2010_p4)
}
 0xb7a   : > { %1877 = dma.vmem_to_hbm [thread:$0]  (%p2204_p10), %s1651_s25, 32, %s1648_s22, %s1632_s0  }
 0xb7b PF: > { %s2605_s28 = sld [smem:[#allocation14_spill]] }
 0xb7c   : > { %s2606_s26 = sld [smem:[#allocation12_spill]] }
 0xb81   : > { %p1883_p5 = scmp.ge.s32.totalorder %s2605_s28, 2 }
 0xb82   : > { %s1665_s23 = sand.u32 1, %s2606_s26  }
 0xb83   : > { %p1880_p6 = pnand %p1883_p5, %p2208_p11  ;;  %s1666_s3 = scalar_lea.sflag [#allocation9], %s1665_s23 }
 0xb85   : > { %p1881_p7 = pneg %p1880_p6 }
 0xb87   : > { %2033 = dma.done.wait (%p1881_p7), %s1666_s3, 32  }
 0xb88   : > { %2035 = vsyncadd (%p1881_p7), %s1666_s3, 4294967264  ;;  %s2608_s24 = sld [smem:[#allocation15_spill]]  ;;  %s2611_s22 = smov %s2042_s2 }
 0xb89   : > { %s2609_s27 = sld [smem:[#allocation13_spill]] }
 0xb8a   : > { %s2610_s23 = sld [smem:[#allocation16_spill]] }
 0xb8e   : > { %p36_p8 = scmp.ge.s32.totalorder %s2608_s24, 6  }
 0xb8f   : > { %s2612_s2 = smov %s2609_s27 }
 0xb90   :  { %38 = sbr.rel (!%p36_p8) target bundleno = 29 (0x1d), region = 138 }
 0xb95   :  { %1679 = vsyncpa [#allocation9], 1 }
 0xb96   :  { %1681 = vsyncpa [#allocation9 + $0x1], 1 }

</bundles_post_ra>
